<compile_context>
chip_gen: v7x
topology: tpu7x:2x2x1
jax: 0.10.0
libtpu: 0.0.40
codegen_flags: <defaults>
</compile_context>

<pallas_src>
import jax
import jax.numpy as jnp
from jax import lax
from jax.experimental import pallas as pl
from jax.experimental.pallas import tpu as pltpu

# JMP / GemNet default activation is ScaledSiLU: silu(x) * (1 / 0.6)
_SCALED_SILU = 1.0 / 0.6
_LANE = 128

# small compat shim (newer JAX: CompilerParams; some older: TPUCompilerParams)
_CompilerParams = getattr(pltpu, "CompilerParams", None) or getattr(
    pltpu, "TPUCompilerParams")


def _round_up(a, b):
    return ((a + b - 1) // b) * b


def _chip_info():
    """(vmem_bytes_per_core, num_tensorcores, is_v7x) with safe fallbacks."""
    kind = ""
    try:
        kind = jax.devices()[0].device_kind.lower()
    except Exception:
        pass
    is_v7 = ("v7" in kind) or ("7x" in kind)
    vmem = (64 if is_v7 else 128) * 1024 * 1024
    try:  # prefer the runtime-reported VMEM capacity when available
        vmem = min(vmem, int(pltpu.get_tpu_info().vmem_capacity_bytes))
    except Exception:
        pass
    cores = 2 if is_v7 else 1
    return vmem, cores, is_v7


def _make_kernel(*, tile_n, m_pad):
    rows = tile_n // _LANE

    def kernel(batch_ref, x_ref, w1_ref, b1_ref, w2_ref, b2_ref, out_ref):
        # Zero the resident output block at the first inner step of each split.
        @pl.when(pl.program_id(1) == 0)
        def _():
            out_ref[...] = jnp.zeros_like(out_ref)

        # ---- per-node MLP (MXU, f32 accumulation) ----
        # ScaledSiLU constant (and optional scale/shift) are folded into w2/b2.
        h = jnp.dot(x_ref[...], w1_ref[...], preferred_element_type=jnp.float32)
        h = jax.nn.silu(h + b1_ref[...])                                 # (tile_n, emb)
        y = jnp.dot(h, w2_ref[...], preferred_element_type=jnp.float32)
        y = y + b2_ref[...]                                              # (tile_n, T)

        # ---- segment reduce over molecules via one-hot matmul ----
        # batch ids arrive lane-dense as (rows, 128); expand to a (tile_n, m_pad)
        # one-hot with a 3-D compare + layout-preserving leading-dim collapse.
        b_rows = batch_ref[...]                                          # (rows, 128) i32
        mol = lax.broadcasted_iota(jnp.int32, (rows, _LANE, m_pad), 2)
        onehot = (b_rows[:, :, None] == mol).astype(jnp.float32)
        onehot = onehot.reshape(tile_n, m_pad)                           # (tile_n, m_pad)

        # out[t, m] += sum_n y[n, t] * onehot[n, m]   (lane-dense molecules)
        out_ref[...] += lax.dot_general(
            y, onehot, (((0,), (0,)), ((), ())),
            preferred_element_type=jnp.float32)                          # (T, m_pad)

    return kernel


def graph_scalar_output_head(x, batch, params, n_molecules, *,
                             scale=None, shift=None, reduction="sum",
                             tile_n=None, num_splits=None, compute_dtype=None):
    """x: (N, emb) node features. batch: (N,) int molecule id per node.
    params = (w1, b1, w2, b2) for the 2-layer MLP (emb->emb, emb->num_targets).
    Returns (n_molecules,) f32 (num_targets == 1). n_molecules is static."""
    if reduction not in ("sum", "mean"):
        raise NotImplementedError(f"reduction={reduction!r}")

    N, emb = x.shape
    w1, b1, w2, b2 = params
    num_targets = w2.shape[1]
    T = num_targets

    # bf16 streaming of x / w1 by default (f32 accumulation in the kernel).
    if compute_dtype is not None:
        cdtype = jnp.dtype(compute_dtype)
    else:
        cdtype = jnp.dtype(jnp.bfloat16) if x.dtype == jnp.float32 else jnp.dtype(x.dtype)

    # ---- fold ScaledSiLU constant + scale/shift into w2 / b2 (once per call) ----
    def _as_vec(v, name):
        if v is None:
            return None
        v = jnp.asarray(v, jnp.float32)
        if v.ndim > 1 or (v.ndim == 1 and v.shape[0] not in (1, T)):
            raise NotImplementedError(
                f"{name} must be a scalar or per-target vector to be folded")
        return v

    scale_v = _as_vec(scale, "scale")
    shift_v = _as_vec(shift, "shift")
    s = jnp.float32(1.0) if scale_v is None else scale_v
    w2_eff = w2.astype(jnp.float32) * (_SCALED_SILU * s)       # (emb, T)
    b2_eff = b2.astype(jnp.float32) * s
    if shift_v is not None:
        b2_eff = b2_eff + shift_v
    b2_eff = jnp.broadcast_to(b2_eff.reshape(-1), (T,))

    # ---- chip-aware sizing ----
    vmem_cap, default_splits, is_v7 = _chip_info()
    num_splits = default_splits if num_splits is None else max(1, int(num_splits))

    m_pad = _round_up(max(int(n_molecules), 1), _LANE)          # lane-dense molecules
    itemsize = cdtype.itemsize

    # per-step working set: weights/biases (x2 buffers) + resident out block (x2)
    fixed = 2 * (emb * emb * itemsize + emb * 4 + emb * T * 4 + T * 4) \
        + 2 * T * m_pad * 4
    # per-node bytes: x (x2 buffers), packed ids (x2), h (f32), onehot (f32), y (f32)
    per_node = 2 * emb * itemsize + 2 * 4 + emb * 4 + m_pad * 4 + T * 4

    budget = (8 if is_v7 else 16) * 1024 * 1024
    if tile_n is None:
        avail = max(budget - fixed, 0)
        tile_n = (avail // per_node) // _LANE * _LANE
        tile_n = max(_LANE, min(8192, tile_n))
    else:
        tile_n = max(_LANE, _round_up(int(tile_n), _LANE))
    tile_n = min(tile_n, _round_up(-(-N // num_splits), _LANE))  # never more than needed

    chunk = num_splits * tile_n
    n_pad = _round_up(N, chunk)
    tiles_per_split = n_pad // chunk
    rows = tile_n // _LANE
    n_tiles_total = num_splits * tiles_per_split

    ws = fixed + per_node * tile_n
    limit_cap = (40 if is_v7 else 64) * 1024 * 1024
    vmem_limit = int(min(limit_cap, max(32 * 1024 * 1024, ws + 8 * 1024 * 1024)))

    # ---- pad inputs; padded nodes get an out-of-range molecule id ----
    x_p = x.astype(cdtype)
    batch_p = batch.astype(jnp.int32)
    if n_pad != N:
        x_p = jnp.pad(x_p, ((0, n_pad - N), (0, 0)))
        # id == n_molecules: either a dropped pad column (< m_pad) or an all-zero
        # one-hot row (== m_pad). Never pollutes real molecules.
        batch_p = jnp.pad(batch_p, (0, n_pad - N), constant_values=int(n_molecules))
    batch_packed = batch_p.reshape(n_tiles_total, rows, _LANE)   # lane-dense ids

    node_map = lambda c, i: (c * tiles_per_split + i, 0)
    batch_map = lambda c, i: (c * tiles_per_split + i, 0, 0)
    const2 = lambda c, i: (0, 0)

    operands = [
        batch_packed,                                   # (tiles, rows, 128) i32
        x_p,                                            # (n_pad, emb) cdtype
        w1.astype(cdtype),                              # (emb, emb)
        b1.reshape(1, emb).astype(jnp.float32),         # (1, emb)
        w2_eff,                                         # (emb, T) f32 (folded)
        b2_eff.reshape(1, T),                           # (1, T)  f32 (folded)
    ]
    in_specs = [
        pl.BlockSpec((None, rows, _LANE), batch_map),
        pl.BlockSpec((tile_n, emb), node_map),
        pl.BlockSpec((emb, emb), const2),
        pl.BlockSpec((1, emb), const2),
        pl.BlockSpec((emb, T), const2),
        pl.BlockSpec((1, T), const2),
    ]

    kernel = _make_kernel(tile_n=tile_n, m_pad=m_pad)

    partials = pl.pallas_call(
        kernel,
        out_shape=jax.ShapeDtypeStruct((num_splits, T, m_pad), jnp.float32),
        grid_spec=pltpu.PrefetchScalarGridSpec(
            num_scalar_prefetch=0,
            grid=(num_splits, tiles_per_split),
            in_specs=in_specs,
            out_specs=pl.BlockSpec((None, T, m_pad), lambda c, i: (c, 0, 0)),
        ),
        compiler_params=_CompilerParams(
            dimension_semantics=("parallel", "arbitrary"),
            vmem_limit_bytes=vmem_limit,
        ),
    )(*operands)

    # ---- combine per-split partials / finalize in the wrapper ----
    total = jnp.sum(partials, axis=0)                   # (T, m_pad)
    seg = total[:, :n_molecules]                        # (T, n_molecules)
    if reduction == "mean":
        cnt = jax.ops.segment_sum(jnp.ones((N,), jnp.float32),
                                  batch.astype(jnp.int32),
                                  num_segments=int(n_molecules))
        seg = seg / jnp.maximum(cnt, 1.0)[None, :]

    # rearrange 'b 1 -> b'  (num_targets == 1)
    return seg[0] if T == 1 else seg.T


def _reference(x, batch, params, n_molecules, scale, shift, reduction):
    w1, b1, w2, b2 = params
    h = jax.nn.silu(x @ w1 + b1) * _SCALED_SILU
    y = h @ w2 + b2
    if scale is not None:
        y = y * scale
    if shift is not None:
        y = y + shift
    seg = jax.ops.segment_sum(y, batch, num_segments=n_molecules)
    if reduction == "mean":
        cnt = jax.ops.segment_sum(jnp.ones((x.shape[0], 1), jnp.float32), batch,
                                  num_segments=n_molecules)
        seg = seg / jnp.maximum(cnt, 1.0)
    return seg[:, 0]


if __name__ == "__main__":
    # keep the plain-XLA reference at full f32 so the comparison is meaningful
    jax.config.update("jax_default_matmul_precision", "highest")

    # small, module-consistent shapes:
    #   emb_size_atom = 32, num_mlps = 2, num_targets = 1
    #   N = 60 atoms across n_molecules = 4 graphs (N not tile-aligned -> padding path)
    key = jax.random.PRNGKey(0)
    k_x, k_b, k_w1, k_b1, k_w2, k_b2 = jax.random.split(key, 6)

    N, emb, num_targets, n_molecules = 60, 32, 1, 4

    x = jax.random.normal(k_x, (N, emb), jnp.float32)
    batch = jax.random.randint(k_b, (N,), 0, n_molecules, jnp.int32)

    w1 = jax.random.normal(k_w1, (emb, emb), jnp.float32) / jnp.sqrt(emb)
    b1 = jax.random.normal(k_b1, (emb,), jnp.float32) * 0.01
    w2 = jax.random.normal(k_w2, (emb, num_targets), jnp.float32) / jnp.sqrt(emb)
    b2 = jax.random.normal(k_b2, (num_targets,), jnp.float32) * 0.01
    params = (w1, b1, w2, b2)

    # 1) sum reduction, exact-f32 streaming -> tight tolerance
    out = graph_scalar_output_head(x, batch, params, n_molecules,
                                   reduction="sum", compute_dtype=jnp.float32)
    out = jax.block_until_ready(out)
    ref = _reference(x, batch, params, n_molecules, None, None, "sum")
    assert out.shape == (n_molecules,)
    assert jnp.allclose(out, ref, atol=5e-3, rtol=5e-3), (out, ref)

    # 2) mean reduction with scale/shift, default bf16 streaming -> looser tolerance
    scale = jnp.float32(1.7)
    shift = jnp.float32(-0.3)
    out2 = graph_scalar_output_head(x, batch, params, n_molecules,
                                    scale=scale, shift=shift, reduction="mean")
    out2 = jax.block_until_ready(out2)
    ref2 = _reference(x, batch, params, n_molecules, scale, shift, "mean")
    assert out2.shape == (n_molecules,)
    assert jnp.allclose(out2, ref2, atol=5e-2, rtol=5e-2), (out2, ref2)

    print("KERNEL_OK")
</pallas_src>

<mosaic_0001>
module attributes {stable_mosaic.version = 11 : i64} {
  func.func @kernel(%arg0: i32, %arg1: i32, %arg2: memref<1x1x128xi32, #tpu.memory_space<vmem>>, %arg3: memref<128x32xf32, #tpu.memory_space<vmem>>, %arg4: memref<32x32xf32, #tpu.memory_space<vmem>>, %arg5: memref<1x32xf32, #tpu.memory_space<vmem>>, %arg6: memref<32x1xf32, #tpu.memory_space<vmem>>, %arg7: memref<1x1xf32, #tpu.memory_space<vmem>>, %arg8: memref<1x1x128xf32, #tpu.memory_space<vmem>>) attributes {dimension_semantics = [#tpu.dimension_semantics<parallel>, #tpu.dimension_semantics<arbitrary>], iteration_bounds = array<i64: 1, 1>, scalar_prefetch = 0 : i64, scratch_operands = 0 : i64, tpu.core_type = #tpu.core_type<tc>, window_params = [{transform_indices = @transform_0, window_bounds = array<i64: 1, 1, 128>}, {transform_indices = @transform_1, window_bounds = array<i64: 128, 32>}, {pipeline_mode = #tpu.pipeline_mode<synchronous>, transform_indices = @transform_2, window_bounds = array<i64: 32, 32>}, {pipeline_mode = #tpu.pipeline_mode<synchronous>, transform_indices = @transform_3, window_bounds = array<i64: 1, 32>}, {pipeline_mode = #tpu.pipeline_mode<synchronous>, transform_indices = @transform_4, window_bounds = array<i64: 32, 1>}, {pipeline_mode = #tpu.pipeline_mode<synchronous>, transform_indices = @transform_5, window_bounds = array<i64: 1, 1>}, {transform_indices = @transform_6, window_bounds = array<i64: 1, 1, 128>}]} {
    %c0_i32 = arith.constant 0 : i32
    %0 = arith.cmpi eq, %arg1, %c0_i32 : i32
    %1 = arith.extui %0 : i1 to i32
    %c0_i32_0 = arith.constant 0 : i32
    %2 = arith.cmpi ne, %1, %c0_i32_0 : i32
    scf.if %2 {
      %cst_22 = arith.constant 0.000000e+00 : f32
      %36 = vector.broadcast %cst_22 : f32 to vector<1x128xf32>
      %c0_23 = arith.constant 0 : index
      %c0_24 = arith.constant 0 : index
      %c0_25 = arith.constant 0 : index
      %37 = vector.load %arg8[%c0_23, %c0_24, %c0_25] : memref<1x1x128xf32, #tpu.memory_space<vmem>>, vector<1x1x128xf32>
      %38 = vector.shape_cast %37 : vector<1x1x128xf32> to vector<1x128xf32>
      %39 = vector.shape_cast %36 : vector<1x128xf32> to vector<1x1x128xf32>
      tpu.vector_store %arg8[%c0_23, %c0_24, %c0_25], %39 {strides = array<i32>} : memref<1x1x128xf32, #tpu.memory_space<vmem>>, vector<1x1x128xf32>,
    } else {
    }
    %c0 = arith.constant 0 : index
    %c0_1 = arith.constant 0 : index
    %3 = vector.load %arg3[%c0, %c0_1] : memref<128x32xf32, #tpu.memory_space<vmem>>, vector<128x32xf32>
    %c0_2 = arith.constant 0 : index
    %c0_3 = arith.constant 0 : index
    %4 = vector.load %arg4[%c0_2, %c0_3] : memref<32x32xf32, #tpu.memory_space<vmem>>, vector<32x32xf32>
    %cst = arith.constant dense<0.000000e+00> : vector<128x32xf32>
    %5 = tpu.matmul %3, %4, %cst {dimension_numbers = #tpu.dot_dimension_numbers<[1], [0], [0], [1], [0, 0, 1, 1], [], []>, precision = #tpu.contract_precision<fp32>} : vector<128x32xf32>, vector<32x32xf32>, vector<128x32xf32> -> vector<128x32xf32>
    %c0_4 = arith.constant 0 : index
    %c0_5 = arith.constant 0 : index
    %6 = vector.load %arg5[%c0_4, %c0_5] : memref<1x32xf32, #tpu.memory_space<vmem>>, vector<1x32xf32>
    %7 = vector.broadcast %6 : vector<1x32xf32> to vector<128x32xf32>
    %8 = arith.addf %5, %7 : vector<128x32xf32>
    %9 = arith.negf %8 : vector<128x32xf32>
    %10 = math.exp %9 : vector<128x32xf32>
    %cst_6 = arith.constant 1.000000e+00 : f32
    %11 = vector.broadcast %cst_6 : f32 to vector<128x32xf32>
    %12 = arith.addf %11, %10 : vector<128x32xf32>
    %13 = arith.divf %11, %12 : vector<128x32xf32>
    %14 = arith.mulf %8, %13 : vector<128x32xf32>
    %c0_7 = arith.constant 0 : index
    %c0_8 = arith.constant 0 : index
    %15 = vector.load %arg6[%c0_7, %c0_8] : memref<32x1xf32, #tpu.memory_space<vmem>>, vector<32x1xf32>
    %cst_9 = arith.constant dense<0.000000e+00> : vector<128x1xf32>
    %16 = tpu.matmul %14, %15, %cst_9 {dimension_numbers = #tpu.dot_dimension_numbers<[1], [0], [0], [1], [0, 0, 1, 1], [], []>, precision = #tpu.contract_precision<fp32>} : vector<128x32xf32>, vector<32x1xf32>, vector<128x1xf32> -> vector<128x1xf32>
    %c0_10 = arith.constant 0 : index
    %c0_11 = arith.constant 0 : index
    %17 = vector.load %arg7[%c0_10, %c0_11] : memref<1x1xf32, #tpu.memory_space<vmem>>, vector<1x1xf32>
    %18 = vector.broadcast %17 : vector<1x1xf32> to vector<128x1xf32>
    %19 = arith.addf %16, %18 : vector<128x1xf32>
    %c0_12 = arith.constant 0 : index
    %c0_13 = arith.constant 0 : index
    %c0_14 = arith.constant 0 : index
    %20 = vector.load %arg2[%c0_12, %c0_13, %c0_14] : memref<1x1x128xi32, #tpu.memory_space<vmem>>, vector<1x1x128xi32>
    %21 = vector.shape_cast %20 : vector<1x1x128xi32> to vector<1x128xi32>
    %22 = tpu.iota {dimensions = array<i32: 2>} : vector<1x128x128xi32>
    %23 = vector.shape_cast %21 : vector<1x128xi32> to vector<1x128x1xi32>
    %24 = vector.broadcast %23 : vector<1x128x1xi32> to vector<1x128x128xi32>
    %25 = arith.cmpi eq, %24, %22 : vector<1x128x128xi32>
    %26 = arith.extui %25 : vector<1x128x128xi1> to vector<1x128x128xi32>
    %27 = arith.sitofp %26 : vector<1x128x128xi32> to vector<1x128x128xf32>
    %28 = vector.shape_cast %27 : vector<1x128x128xf32> to vector<128x128xf32>
    %c0_15 = arith.constant 0 : index
    %c0_16 = arith.constant 0 : index
    %c0_17 = arith.constant 0 : index
    %29 = vector.load %arg8[%c0_15, %c0_16, %c0_17] : memref<1x1x128xf32, #tpu.memory_space<vmem>>, vector<1x1x128xf32>
    %30 = vector.shape_cast %29 : vector<1x1x128xf32> to vector<1x128xf32>
    %cst_18 = arith.constant dense<0.000000e+00> : vector<1x128xf32>
    %31 = tpu.matmul %19, %28, %cst_18 {dimension_numbers = #tpu.dot_dimension_numbers<[0], [0], [1], [1], [0, 1, 1, 1], [], []>, precision = #tpu.contract_precision<fp32>} : vector<128x1xf32>, vector<128x128xf32>, vector<1x128xf32> -> vector<1x128xf32>
    %32 = arith.addf %30, %31 : vector<1x128xf32>
    %c0_19 = arith.constant 0 : index
    %c0_20 = arith.constant 0 : index
    %c0_21 = arith.constant 0 : index
    %33 = vector.load %arg8[%c0_19, %c0_20, %c0_21] : memref<1x1x128xf32, #tpu.memory_space<vmem>>, vector<1x1x128xf32>
    %34 = vector.shape_cast %33 : vector<1x1x128xf32> to vector<1x128xf32>
    %35 = vector.shape_cast %32 : vector<1x128xf32> to vector<1x1x128xf32>
    tpu.vector_store %arg8[%c0_19, %c0_20, %c0_21], %35 {strides = array<i32>} : memref<1x1x128xf32, #tpu.memory_space<vmem>>, vector<1x1x128xf32>,
    return
  }
  func.func @transform_0(%arg0: i32, %arg1: i32) -> (i32, i32, i32) {
    %c1_i32 = arith.constant 1 : i32
    %0 = arith.muli %arg0, %c1_i32 : i32
    %1 = arith.addi %0, %arg1 : i32
    %c0_i32 = arith.constant 0 : i32
    %c0_i32_0 = arith.constant 0 : i32
    %c0_i32_1 = arith.constant 0 : i32
    return %1, %c0_i32, %c0_i32_0 : i32, i32, i32
  }
  func.func @transform_1(%arg0: i32, %arg1: i32) -> (i32, i32) {
    %c1_i32 = arith.constant 1 : i32
    %0 = arith.muli %arg0, %c1_i32 : i32
    %1 = arith.addi %0, %arg1 : i32
    %c0_i32 = arith.constant 0 : i32
    %c0_i32_0 = arith.constant 0 : i32
    return %1, %c0_i32 : i32, i32
  }
  func.func @transform_2(%arg0: i32, %arg1: i32) -> (i32, i32) {
    %c0_i32 = arith.constant 0 : i32
    %c0_i32_0 = arith.constant 0 : i32
    %c0_i32_1 = arith.constant 0 : i32
    return %c0_i32, %c0_i32_0 : i32, i32
  }
  func.func @transform_3(%arg0: i32, %arg1: i32) -> (i32, i32) {
    %c0_i32 = arith.constant 0 : i32
    %c0_i32_0 = arith.constant 0 : i32
    %c0_i32_1 = arith.constant 0 : i32
    return %c0_i32, %c0_i32_0 : i32, i32
  }
  func.func @transform_4(%arg0: i32, %arg1: i32) -> (i32, i32) {
    %c0_i32 = arith.constant 0 : i32
    %c0_i32_0 = arith.constant 0 : i32
    %c0_i32_1 = arith.constant 0 : i32
    return %c0_i32, %c0_i32_0 : i32, i32
  }
  func.func @transform_5(%arg0: i32, %arg1: i32) -> (i32, i32) {
    %c0_i32 = arith.constant 0 : i32
    %c0_i32_0 = arith.constant 0 : i32
    %c0_i32_1 = arith.constant 0 : i32
    return %c0_i32, %c0_i32_0 : i32, i32
  }
  func.func @transform_6(%arg0: i32, %arg1: i32) -> (i32, i32, i32) {
    %c0_i32 = arith.constant 0 : i32
    %c0_i32_0 = arith.constant 0 : i32
    %c0_i32_1 = arith.constant 0 : i32
    return %arg0, %c0_i32, %c0_i32_0 : i32, i32, i32
  }
}

</mosaic_0001>

<bundles_post_ra>
// kernel: tpu_custom_call.1
= control target key start
LH: loop header
LB: loop body
LE: loop exit
PB: predicated region body
PF: predicated region fallthrough
CT: control target
= control target key end

     0   :  { %s6139_s0 = inlined_call_operand.vmem [shape: s32[1,1,128], index: 0, kind: input, shape index: {}]   ;;  %s6140_s1 = inlined_call_operand.vmem [shape: f32[128,32], index: 1, kind: input, shape index: {}]   ;;  %s6141_s2 = inlined_call_operand.vmem [shape: f32[32,32], index: 2, kind: input, shape index: {}]   ;;  %s6142_s3 = inlined_call_operand.vmem [shape: f32[1,32], index: 3, kind: input, shape index: {}]   ;;  %s6143_s4 = inlined_call_operand.vmem [shape: f32[32,1], index: 4, kind: input, shape index: {}]   ;;  %s6144_s5 = inlined_call_operand.<no memory space> [shape: f32[1,1], index: 5, kind: input, shape index: {}]   ;;  %s6145_s6 = inlined_call_operand.hbm [shape: f32[1,1,128], index: 6, kind: output, shape index: {}]  }
   0x1   :  { %v11_v0 = vstv %s6144_s5 }
   0x2   :  { %12 = vst [vmem:[#allocation2] sm:$0x1] %v11_v0 }
   0x3   :  { %v83_v1 = vld [vmem:[%s6141_s2] sm:$0xff]  ;;  %v84_v2 = vld [vmem:[%s6141_s2 + $0x8] sm:$0xff]  ;;  %v4987_v3 = vld [vmem:[%s6141_s2 + $0x10] sm:$0xff]  ;;  %vm94_vm0 = vcmask 261120  }
   0x4   :  { %v144_v4 = vand.u32 4294901760, %v83_v1  ;;  %v147_v5 = vand.u32 4294901760, %v84_v2  ;;  %v4992_v6 = vld [vmem:[%s6141_s2 + $0x18] sm:$0xff]  ;;  %v150_v7 = vand.u32 4294901760, %v4987_v3  ;;  %v67_v8 = vld [vmem:[%s6140_s1] sm:$0xff]  ;;  %v68_v9 = vld [vmem:[%s6140_s1 + $0x8] sm:$0xff] }
   0x5   :  { %v153_v10 = vand.u32 4294901760, %v4992_v6  ;;  %v96_v11 = vsel %vm94_vm0, %v67_v8, 0  ;;  %v99_v12 = vsel %vm94_vm0, %v68_v9, 0  ;;  %v69_v13 = vld [vmem:[%s6140_s1 + $0x10] sm:$0xff]  ;;  %v70_v14 = vld [vmem:[%s6140_s1 + $0x18] sm:$0xff]  ;;  %v71_v19 = vld [vmem:[%s6140_s1 + $0x20] sm:$0xff] }
   0x6   :  { %v5010_v15 = vpack.c.bf16 %v147_v5, %v144_v4  ;;  %v5012_v16 = vand.u32 4294901760, %v96_v11  ;;  %v5014_v17 = vand.u32 4294901760, %v99_v12  ;;  %v5016_v18 = vsub.f32 %v83_v1, %v144_v4  ;;  %v72_v20 = vld [vmem:[%s6140_s1 + $0x28] sm:$0xff] }
   0x7   :  { %v5028_v21 = vpack.c.bf16 %v153_v10, %v150_v7  ;;  %v5030_v22 = vsub.f32 %v84_v2, %v147_v5  ;;  %v102_v23 = vsel %vm94_vm0, %v69_v13, 0  ;;  %v105_v24 = vsel %vm94_vm0, %v70_v14, 0 }
   0x8   :  { %4411 = vmatprep.subr.bf16.mxu0 %v5010_v15  ;;  %v5036_v25 = vsub.f32 %v96_v11, %v5012_v16  ;;  %v5039_v26 = vsub.f32 %v99_v12, %v5014_v17  ;;  %v375_v27 = vand.u32 4294901760, %v5016_v18  ;;  %v5042_v28 = vand.u32 4294901760, %v102_v23 }
   0x9   :  { %4413 = vmatpush3.bf16.msra.mxu0 %v5010_v15  ;;  %v382_v29 = vand.u32 4294901760, %v5030_v22  ;;  %v5046_v30 = vand.u32 4294901760, %v105_v24  ;;  %v108_v31 = vsel %vm94_vm0, %v71_v19, 0  ;;  %v111_v32 = vsel %vm94_vm0, %v72_v20, 0 }
   0xa   :  { %4415 = vmatprep.subr.bf16.mxu0 %v5028_v21  ;;  %v214_v33 = vand.u32 4294901760, %v5036_v25  ;;  %v224_v34 = vand.u32 4294901760, %v5039_v26  ;;  %v376_v35 = vsub.f32 %v5016_v18, %v375_v27  ;;  %v5057_v36 = vsub.f32 %v102_v23, %v5042_v28 }
   0xb   :  { %13 = vsyncpa [#allocation4], 0  ;;  %v383_v37 = vsub.f32 %v5030_v22, %v382_v29  ;;  %v5063_v38 = vsub.f32 %v105_v24, %v5046_v30  ;;  %v5065_v39 = vand.u32 4294901760, %v108_v31  ;;  %v5067_v40 = vand.u32 4294901760, %v111_v32  ;;  %v73_v41 = vld [vmem:[%s6140_s1 + $0x30] sm:$0xff]  ;;  %v74_v50 = vld [vmem:[%s6140_s1 + $0x38] sm:$0xff] }
   0xc   :  { %v215_v42 = vsub.f32 %v5036_v25, %v214_v33  ;;  %v225_v43 = vsub.f32 %v5039_v26, %v224_v34  ;;  %v377_v44 = vand.u32 4294901760, %v376_v35  ;;  %v234_v45 = vand.u32 4294901760, %v5057_v36  ;;  %v75_v51 = vld [vmem:[%s6140_s1 + $0x40] sm:$0xff]  ;;  %v76_v60 = vld [vmem:[%s6140_s1 + $0x48] sm:$0xff]  ;;  %v77_v13 = vld [vmem:[%s6140_s1 + $0x50] sm:$0xff] }
   0xd   :  { %4417 = vmatpush3.bf16.msra.mxu0 %v5028_v21  ;;  %v384_v46 = vand.u32 4294901760, %v383_v37  ;;  %v244_v47 = vand.u32 4294901760, %v5063_v38  ;;  %v5082_v48 = vsub.f32 %v108_v31, %v5065_v39  ;;  %v5085_v49 = vsub.f32 %v111_v32, %v5067_v40  ;;  %v78_v14 = vld [vmem:[%s6140_s1 + $0x58] sm:$0xff] }
   0xe   :  { %v216_v52 = vand.u32 4294901760, %v215_v42  ;;  %v226_v53 = vand.u32 4294901760, %v225_v43  ;;  %v235_v54 = vsub.f32 %v5057_v36, %v234_v45  ;;  %v114_v55 = vsel %vm94_vm0, %v73_v41, 0 }
   0xf   :  { %v4418_v56 = vpack.c.bf16 %v384_v46, %v377_v44  ;;  %v245_v57 = vsub.f32 %v5063_v38, %v244_v47  ;;  %v254_v58 = vand.u32 4294901760, %v5082_v48  ;;  %v264_v59 = vand.u32 4294901760, %v5085_v49 }
  0x10   :  { %3824 = vmatprep.mubr.f32.mxu0 %v216_v52  ;;  %v236_v61 = vand.u32 4294901760, %v235_v54  ;;  %v5105_v62 = vand.u32 4294901760, %v114_v55  ;;  %v117_v63 = vsel %vm94_vm0, %v74_v50, 0  ;;  %v120_v0 = vsel %vm94_vm0, %v75_v51, 0  ;;  %v80_v54 = vld [vmem:[%s6140_s1 + $0x68] sm:$0xff] }
  0x11   :  { %3825 = vmatmul.mubr.f32.vlgmr.msra.gmra.mrb[0].mxu0 %v226_v53  ;;  %4419 = vmatprep.subr.bf16.mxu0 %v4418_v56  ;;  %v246_v1 = vand.u32 4294901760, %v245_v57  ;;  %v255_v2 = vsub.f32 %v5082_v48, %v254_v58  ;;  %v265_v4 = vsub.f32 %v5085_v49, %v264_v59  ;;  %v5115_v5 = vand.u32 4294901760, %v117_v63  ;;  %v79_v53 = vld [vmem:[%s6140_s1 + $0x60] sm:$0xff] }
  0x12   :  { %4421 = vmatpush3.bf16.msra.mxu0 %v4418_v56  ;;  %3827 = vmatprep.mubr.f32.mxu0 %v236_v61  ;;  %v5118_v8 = vsub.f32 %v114_v55, %v5105_v62  ;;  %v5120_v9 = vand.u32 4294901760, %v120_v0  ;;  %v123_v11 = vsel %vm94_vm0, %v76_v60, 0  ;;  %v5126_v12 = vsub.f32 %v4987_v3, %v150_v7 }
  0x13   :  { %v256_v19 = vand.u32 4294901760, %v255_v2  ;;  %v266_v20 = vand.u32 4294901760, %v265_v4  ;;  %v5135_v23 = vsub.f32 %v117_v63, %v5115_v5  ;;  %v5137_v24 = vand.u32 4294901760, %v123_v11  ;;  %v81_v2 = vld [vmem:[%s6140_s1 + $0x70] sm:$0xff]  ;;  %v82_v4 = vld [vmem:[%s6140_s1 + $0x78] sm:$0xff] }
  0x14   :  { %v274_v31 = vand.u32 4294901760, %v5118_v8  ;;  %v5141_v3 = vsub.f32 %v120_v0, %v5120_v9  ;;  %v389_v7 = vand.u32 4294901760, %v5126_v12  ;;  %v5147_v32 = vsub.f32 %v4992_v6, %v153_v10 }
  0x15   :  { %3828 = vmatmul.mubr.f32.gmra.mrb[2].mxu0 %v246_v1  ;;  %v284_v35 = vand.u32 4294901760, %v5135_v23  ;;  %v5151_v37 = vsub.f32 %v123_v11, %v5137_v24  ;;  %v126_v41 = vsel %vm94_vm0, %v77_v13, 0  ;;  %v129_v42 = vsel %vm94_vm0, %v78_v14, 0 }
  0x16   :  { %3830 = vmatprep.mubr.f32.mxu0 %v256_v19  ;;  %v275_v43 = vsub.f32 %v5118_v8, %v274_v31  ;;  %v294_v44 = vand.u32 4294901760, %v5141_v3  ;;  %v390_v6 = vsub.f32 %v5126_v12, %v389_v7  ;;  %v396_v10 = vand.u32 4294901760, %v5147_v32 }
  0x17   :  { %v285_v46 = vsub.f32 %v5135_v23, %v284_v35  ;;  %v6146_v50 = vand.u32 4294901760, %v5151_v37  ;;  %v5165_v51 = vand.u32 4294901760, %v126_v41  ;;  %v5167_v52 = vand.u32 4294901760, %v129_v42 }
  0x18   :  { %v276_v55 = vand.u32 4294901760, %v275_v43  ;;  %v295_v56 = vsub.f32 %v5141_v3, %v294_v44  ;;  %v391_v57 = vand.u32 4294901760, %v390_v6  ;;  %v397_v60 = vsub.f32 %v5147_v32, %v396_v10 }
  0x19   :  { %3831 = vmatmul.mubr.f32.gmra.mrb[4].mxu0 %v266_v20  ;;  %v286_v61 = vand.u32 4294901760, %v285_v46  ;;  %v305_v63 = vsub.f32 %v5151_v37, %v6146_v50  ;;  %v5183_v0 = vsub.f32 %v126_v41, %v5165_v51  ;;  %v5186_v1 = vsub.f32 %v129_v42, %v5167_v52 }
  0x1a   :  { %3833 = vmatprep.mubr.f32.mxu0 %v276_v55  ;;  %v296_v11 = vand.u32 4294901760, %v295_v56  ;;  %v398_v13 = vand.u32 4294901760, %v397_v60  ;;  %v132_v14 = vsel %vm94_vm0, %v79_v53, 0  ;;  %v135_v19 = vsel %vm94_vm0, %v80_v54, 0 }
  0x1b   :  { %v306_v20 = vand.u32 4294901760, %v305_v63  ;;  %v6148_v41 = vand.u32 4294901760, %v5183_v0  ;;  %v6147_v42 = vand.u32 4294901760, %v5186_v1  ;;  %v5198_v43 = vand.u32 4294901760, %v132_v14 }
  0x1c   :  { %v4422_v6 = vpack.c.bf16 %v398_v13, %v391_v57  ;;  %v5200_v46 = vand.u32 4294901760, %v135_v19  ;;  %v138_v50 = vsel %vm94_vm0, %v81_v2, 0  ;;  %v141_v55 = vsel %vm94_vm0, %v82_v4, 0 }
  0x1d   :  { %3834 = vmatmul.mubr.f32.gmra.mrb[6].mxu0 %v286_v61  ;;  %v315_v53 = vsub.f32 %v5183_v0, %v6148_v41  ;;  %v325_v54 = vsub.f32 %v5186_v1, %v6147_v42  ;;  %v5211_v56 = vsub.f32 %v132_v14, %v5198_v43  ;;  %v5213_v60 = vand.u32 4294901760, %v138_v50 }
  0x1e   :  { %3836 = vmatprep.mubr.f32.mxu0 %v296_v11  ;;  %4423 = vmatprep.subr.bf16.mxu0 %v4422_v6  ;;  %v5216_v57 = vsub.f32 %v135_v19, %v5200_v46  ;;  %v5218_v63 = vand.u32 4294901760, %v141_v55  ;;  %v4426_v61 = vpack.c.bf16 %v5030_v22, %v5016_v18  ;;  %v4442_v19 = vpack.c.bf16 %v382_v29, %v375_v27 }
  0x1f   :  { %4425 = vmatpush3.bf16.msra.mxu0 %v4422_v6  ;;  %v316_v2 = vand.u32 4294901760, %v315_v53  ;;  %v334_v4 = vand.u32 4294901760, %v5211_v56  ;;  %v5224_v13 = vsub.f32 %v138_v50, %v5213_v60  ;;  %v5234_v42 = vpack.c.bf16 %v396_v10, %v389_v7 }
  0x20   :  { %v344_v14 = vand.u32 4294901760, %v5216_v57  ;;  %v5228_v11 = vsub.f32 %v141_v55, %v5218_v63  ;;  %4427 = vmatprep.subr.bf16.mxu0 %v4426_v61  ;;  %v326_v6 = vand.u32 4294901760, %v325_v54 }
  0x21   :  { %3837 = vmatmul.mubr.f32.gmra.mrb[8].mxu0 %v306_v20  ;;  %v335_v50 = vsub.f32 %v5211_v56, %v334_v4  ;;  %v354_v53 = vand.u32 4294901760, %v5224_v13  ;;  %v4430_v20 = vpack.c.bf16 %v5147_v32, %v5126_v12 }
  0x22   :  { %3839 = vmatprep.mubr.f32.mxu0 %v316_v2  ;;  %v345_v55 = vsub.f32 %v5216_v57, %v344_v14  ;;  %v364_v18 = vand.u32 4294901760, %v5228_v11 }
  0x23   :  { %v336_v41 = vand.u32 4294901760, %v335_v50  ;;  %v355_v22 = vsub.f32 %v5224_v13, %v354_v53 }
  0x24   :  { %v346_v27 = vand.u32 4294901760, %v345_v55  ;;  %v365_v29 = vsub.f32 %v5228_v11, %v364_v18 }
  0x25   :  { %3840 = vmatmul.mubr.f32.gmra.mrb[10].mxu0 %v326_v6  ;;  %v356_v7 = vand.u32 4294901760, %v355_v22 }
  0x26   :  { %3842 = vmatprep.mubr.f32.mxu0 %v336_v41  ;;  %v366_v10 = vand.u32 4294901760, %v365_v29 }
  0x29   :  { %3843 = vmatmul.mubr.f32.gmra.mrb[12].mxu0 %v346_v27 }
  0x2a   :  { %3845 = vmatprep.mubr.f32.mxu0 %v356_v7 }
  0x2d   :  { %3846 = vmatmul.mubr.f32.gmra.mrb[14].mxu0 %v366_v10 }
  0x2e   :  { %3856 = vmatprep.mubr.f32.mxu0 %v5012_v16 }
  0x31   :  { %3857 = vmatmul.mubr.f32.vlgmr.msra.gmra.mrb[0].mxu0 %v5014_v17 }
  0x32   :  { %4429 = vmatpush3.bf16.msra.mxu0 %v4426_v61  ;;  %3859 = vmatprep.mubr.f32.mxu0 %v5042_v28 }
  0x33   :  { %4431 = vmatprep.subr.bf16.mxu0 %v4430_v20 }
  0x35   :  { %3860 = vmatmul.mubr.f32.gmra.mrb[2].mxu0 %v5046_v30 }
  0x36   :  { %3862 = vmatprep.mubr.f32.mxu0 %v5065_v39  ;;  %4433 = vmatpush3.bf16.msra.mxu0 %v4430_v20 }
  0x37   :  { %4435 = vmatprep.subr.bf16.mxu0 %v5010_v15 }
  0x39   :  { %3863 = vmatmul.mubr.f32.gmra.mrb[4].mxu0 %v5067_v40 }
  0x3a   :  { %3865 = vmatprep.mubr.f32.mxu0 %v5105_v62 }
  0x3d   :  { %3866 = vmatmul.mubr.f32.gmra.mrb[6].mxu0 %v5115_v5 }
  0x3e   :  { %3868 = vmatprep.mubr.f32.mxu0 %v5120_v9 }
  0x41   :  { %3869 = vmatmul.mubr.f32.gmra.mrb[8].mxu0 %v5137_v24 }
  0x42   :  { %3871 = vmatprep.mubr.f32.mxu0 %v5165_v51 }
  0x45   :  { %3872 = vmatmul.mubr.f32.gmra.mrb[10].mxu0 %v5167_v52 }
  0x46   :  { %3874 = vmatprep.mubr.f32.mxu0 %v5198_v43 }
  0x49   :  { %3875 = vmatmul.mubr.f32.gmra.mrb[12].mxu0 %v5200_v46 }
  0x4a   :  { %3877 = vmatprep.mubr.f32.mxu0 %v5213_v60 }
  0x4d   :  { %3878 = vmatmul.mubr.f32.gmra.mrb[14].mxu0 %v5218_v63 }
  0x4e   :  { %3888 = vmatprep.mubr.f32.mxu0 %v5036_v25  ;;  %v6154_v25 = vand.u32 4294901760, %v5151_v37 }
  0x51   :  { %3889 = vmatmul.mubr.f32.vlgmr.msra.gmra.mrb[0].mxu0 %v5039_v26  ;;  %v6155_v26 = vand.u32 4294901760, %v5183_v0 }
  0x52   :  { %4437 = vmatpush3.bf16.msra.mxu0 %v5010_v15  ;;  %3891 = vmatprep.mubr.f32.mxu0 %v5057_v36 }
  0x53   :  { %4439 = vmatprep.subr.bf16.mxu0 %v5028_v21 }
  0x55   :  { %3892 = vmatmul.mubr.f32.gmra.mrb[2].mxu0 %v5063_v38 }
  0x56   :  { %3894 = vmatprep.mubr.f32.mxu0 %v5082_v48  ;;  %4441 = vmatpush3.bf16.msra.mxu0 %v5028_v21 }
  0x57   :  { %4443 = vmatprep.subr.bf16.mxu0 %v4442_v19 }
  0x59   :  { %3895 = vmatmul.mubr.f32.gmra.mrb[4].mxu0 %v5085_v49 }
  0x5a   :  { %3897 = vmatprep.mubr.f32.mxu0 %v5118_v8 }
  0x5d   :  { %3898 = vmatmul.mubr.f32.gmra.mrb[6].mxu0 %v5135_v23 }
  0x5e   :  { %3900 = vmatprep.mubr.f32.mxu0 %v5141_v3 }
  0x61   :  { %3901 = vmatmul.mubr.f32.gmra.mrb[8].mxu0 %v5151_v37 }
  0x62   :  { %3903 = vmatprep.mubr.f32.mxu0 %v5183_v0 }
  0x65   :  { %3904 = vmatmul.mubr.f32.gmra.mrb[10].mxu0 %v5186_v1 }
  0x66   :  { %3906 = vmatprep.mubr.f32.mxu0 %v5211_v56 }
  0x69   :  { %3907 = vmatmul.mubr.f32.gmra.mrb[12].mxu0 %v5216_v57 }
  0x6a   :  { %3909 = vmatprep.mubr.f32.mxu0 %v5224_v13 }
  0x6d   :  { %3910 = vmatmul.mubr.f32.gmra.mrb[14].mxu0 %v5228_v11 }
  0x6e   :  { %3920 = vmatprep.mubr.f32.mxu0 %v214_v33  ;;  %v6156_v33 = vand.u32 4294901760, %v5186_v1 }
  0x71   :  { %3921 = vmatmul.mubr.f32.vlgmr.msra.gmra.mrb[0].mxu0 %v224_v34  ;;  %v1388_v34 = vld [vmem:[%s6143_s4 + $0x18] sm:$0xff] }
  0x72   :  { %4445 = vmatpush3.bf16.msra.mxu0 %v4442_v19  ;;  %3923 = vmatprep.mubr.f32.mxu0 %v234_v45  ;;  %v1454_v38 = vand.u32 4294901760, %v1388_v34 }
  0x73   :  { %4447 = vmatprep.subr.bf16.mxu0 %v5234_v42 }
  0x75   :  { %3924 = vmatmul.mubr.f32.gmra.mrb[2].mxu0 %v244_v47 }
  0x76   :  { %3926 = vmatprep.mubr.f32.mxu0 %v254_v58  ;;  %4449 = vmatpush3.bf16.msra.mxu0 %v5234_v42 }
  0x77   :  { %4451 = vmatprep.subr.bf16.mxu0 %v5010_v15 }
  0x79   :  { %3927 = vmatmul.mubr.f32.gmra.mrb[4].mxu0 %v264_v59 }
  0x7a   :  { %3929 = vmatprep.mubr.f32.mxu0 %v274_v31 }
  0x7d   :  { %3930 = vmatmul.mubr.f32.gmra.mrb[6].mxu0 %v284_v35 }
  0x7e   :  { %3932 = vmatprep.mubr.f32.mxu0 %v294_v44 }
  0x81   :  { %3933 = vmatmul.mubr.f32.gmra.mrb[8].mxu0 %v6154_v25 }
  0x82   :  { %3935 = vmatprep.mubr.f32.mxu0 %v6155_v26 }
  0x85   :  { %3936 = vmatmul.mubr.f32.gmra.mrb[10].mxu0 %v6156_v33 }
  0x86   :  { %3938 = vmatprep.mubr.f32.mxu0 %v334_v4 }
  0x89   :  { %3939 = vmatmul.mubr.f32.gmra.mrb[12].mxu0 %v344_v14 }
  0x8a   :  { %3941 = vmatprep.mubr.f32.mxu0 %v354_v53 }
  0x8d   :  { %3942 = vmatmul.mubr.f32.gmra.mrb[14].mxu0 %v364_v18 }
  0x8e   :  { %3952 = vmatprep.mubr.f32.mxu0 %v5012_v16 }
  0x91   :  { %3953 = vmatmul.mubr.f32.vlgmr.msra.gmra.mrb[0].mxu0 %v5014_v17 }
  0x92   :  { %4453 = vmatpush3.bf16.msra.mxu0 %v5010_v15  ;;  %3955 = vmatprep.mubr.f32.mxu0 %v5042_v28  ;;  %v1385_v15 = vld [vmem:[%s6143_s4] sm:$0xff] }
  0x93   :  { %4455 = vmatprep.subr.bf16.mxu0 %v5028_v21 }
  0x95   :  { %3956 = vmatmul.mubr.f32.gmra.mrb[2].mxu0 %v5046_v30 }
  0x96   :  { %3958 = vmatprep.mubr.f32.mxu0 %v5065_v39  ;;  %4457 = vmatpush3.bf16.msra.mxu0 %v5028_v21 }
  0x99   :  { %3959 = vmatmul.mubr.f32.gmra.mrb[4].mxu0 %v5067_v40 }
  0x9a   :  { %3961 = vmatprep.mubr.f32.mxu0 %v5105_v62 }
  0x9d   :  { %3962 = vmatmul.mubr.f32.gmra.mrb[6].mxu0 %v5115_v5 }
  0x9e   :  { %3964 = vmatprep.mubr.f32.mxu0 %v5120_v9 }
  0xa1   :  { %3965 = vmatmul.mubr.f32.gmra.mrb[8].mxu0 %v5137_v24 }
  0xa2   :  { %3967 = vmatprep.mubr.f32.mxu0 %v5165_v51 }
  0xa5   :  { %3968 = vmatmul.mubr.f32.gmra.mrb[10].mxu0 %v5167_v52 }
  0xa6   :  { %3970 = vmatprep.mubr.f32.mxu0 %v5198_v43 }
  0xa9   :  { %3971 = vmatmul.mubr.f32.gmra.mrb[12].mxu0 %v5200_v46 }
  0xaa   :  { %3973 = vmatprep.mubr.f32.mxu0 %v5213_v60 }
  0xad   :  { %3974 = vmatmul.mubr.f32.gmra.mrb[14].mxu0 %v5218_v63 }
  0xae   :  { %3984 = vmatprep.mubr.f32.mxu0 %v5012_v16  ;;  %v1386_v16 = vld [vmem:[%s6143_s4 + $0x8] sm:$0xff] }
  0xaf   :  { %v1448_v21 = vand.u32 4294901760, %v1386_v16 }
  0xb1   :  { %3985 = vmatmul.mubr.f32.vlgmr.msra.gmra.mrb[0].mxu0 %v5014_v17  ;;  %v1445_v17 = vand.u32 4294901760, %v1385_v15  ;;  %v5380_v45 = vsub.f32 %v1386_v16, %v1448_v21 }
  0xb2   :  { %3987 = vmatprep.mubr.f32.mxu0 %v5042_v28 }
  0xb3   :  { %v5364_v28 = vpack.c.bf16 %v1448_v21, %v1445_v17  ;;  %v1683_v48 = vand.u32 4294901760, %v5380_v45 }
  0xb5   :  { %3988 = vmatmul.mubr.f32.gmra.mrb[2].mxu0 %v5046_v30  ;;  %v1387_v30 = vld [vmem:[%s6143_s4 + $0x10] sm:$0xff]  ;;  %4459 = vmatprep.subr.bf16.mxu1 %v5364_v28  ;;  %v1684_v58 = vsub.f32 %v5380_v45, %v1683_v48 }
  0xb6   :  { %3990 = vmatprep.mubr.f32.mxu0 %v5065_v39  ;;  %v1451_v36 = vand.u32 4294901760, %v1387_v30  ;;  %4461 = vmatpush3.bf16.msra.mxu1 %v5364_v28 }
  0xb7   :  { %v1685_v8 = vand.u32 4294901760, %v1684_v58 }
  0xb8   :  { %v5374_v39 = vpack.c.bf16 %v1454_v38, %v1451_v36  ;;  %v5390_v59 = vsub.f32 %v1387_v30, %v1451_v36 }
  0xb9   :  { %3991 = vmatmul.mubr.f32.gmra.mrb[4].mxu0 %v5067_v40  ;;  %v5378_v40 = vsub.f32 %v1385_v15, %v1445_v17 }
  0xba   :  { %3993 = vmatprep.mubr.f32.mxu0 %v5105_v62  ;;  %4463 = vmatprep.subr.bf16.mxu1 %v5374_v39  ;;  %v5392_v62 = vsub.f32 %v1388_v34, %v1454_v38 }
  0xbb   :  { %4465 = vmatpush3.bf16.msra.mxu1 %v5374_v39  ;;  %v1676_v47 = vand.u32 4294901760, %v5378_v40  ;;  %v5409_v37 = vpack.c.bf16 %v5380_v45, %v5378_v40 }
  0xbc   :  { %v1697_v12 = vand.u32 4294901760, %v5392_v62  ;;  %v5413_v44 = vpack.c.bf16 %v5392_v62, %v5390_v59 }
  0xbd   :  { %3994 = vmatmul.mubr.f32.gmra.mrb[6].mxu0 %v5115_v5  ;;  %v1677_v49 = vsub.f32 %v5378_v40, %v1676_v47 }
  0xbe   :  { %3996 = vmatprep.mubr.f32.mxu0 %v5120_v9  ;;  %v1690_v9 = vand.u32 4294901760, %v5390_v59  ;;  %v1698_v31 = vsub.f32 %v5392_v62, %v1697_v12 }
  0xbf   :  { %v1678_v5 = vand.u32 4294901760, %v1677_v49 }
  0xc0   :  { %v1699_v32 = vand.u32 4294901760, %v1698_v31  ;;  %v4494_v40 = vpack.c.bf16 %v1697_v12, %v1690_v9 }
  0xc1   :  { %3997 = vmatmul.mubr.f32.gmra.mrb[8].mxu0 %v5137_v24  ;;  %v5396_v23 = vpack.c.bf16 %v1685_v8, %v1678_v5  ;;  %v1691_v24 = vsub.f32 %v5390_v59, %v1690_v9  ;;  %v4935_v9 = vmov 0.0  }
  0xc2   :  { %3999 = vmatprep.mubr.f32.mxu0 %v5165_v51  ;;  %v5418_v51 = vld [vmem:[%s6142_s3] ss:$0 sm:$0xff]  ;;  %66 = vst [vmem:[#allocation3] sm:$0x1] %v4935_v9 }
  0xc3   :  { %4467 = vmatprep.subr.bf16.mxu1 %v5396_v23  ;;  %v1692_v3 = vand.u32 4294901760, %v1691_v24 }
  0xc5   :  { %4000 = vmatmul.mubr.f32.gmra.mrb[10].mxu0 %v5167_v52  ;;  %v5405_v35 = vpack.c.bf16 %v1699_v32, %v1692_v3 }
  0xc6   :  { %4002 = vmatprep.mubr.f32.mxu0 %v5198_v43 }
  0xc9   :  { %4003 = vmatmul.mubr.f32.gmra.mrb[12].mxu0 %v5200_v46 }
  0xca   :  { %4005 = vmatprep.mubr.f32.mxu0 %v5213_v60 }
  0xcd   :  { %4006 = vmatmul.mubr.f32.gmra.mrb[14].mxu0 %v5218_v63 }
 0x184   :  { %v3986_v52 = vpop.f32.mrb[0].mxu0 }
 0x185   :  { %v5421_v0 = vadd.f32 %v3986_v52, %v5418_v51  ;;  %v1179_v1 = vpop.f32.mrb[1].mxu0 }
 0x186   :  { %v5424_v41 = vadd.f32 %v5418_v51, %v1179_v1 }
 0x187   :  { %v3393_v42 = vmul.f32 -1.442695, %v5421_v0 }
 0x188   :  { %v3392_v43 = vmul.f32 -1.442695, %v5424_v41  ;;  %v3989_v46 = vpop.f32.mrb[2].mxu0 }
 0x189   :  { %4847 = vpow2.f32 %v3393_v42  ;;  %v5429_v54 = vadd.f32 %v3989_v46, %v5418_v51  ;;  %v1191_v56 = vpop.f32.mrb[3].mxu0 }
 0x18a   :  { %4849 = vpow2.f32 %v3392_v43  ;;  %v5432_v60 = vadd.f32 %v5418_v51, %v1191_v56 }
 0x18b   :  { %v3395_v57 = vmul.f32 -1.442695, %v5429_v54 }
 0x18c   :  { %v3394_v63 = vmul.f32 -1.442695, %v5432_v60  ;;  %v3992_v61 = vpop.f32.mrb[4].mxu0 }
 0x18d   :  { %4851 = vpow2.f32 %v3395_v57  ;;  %v5437_v2 = vadd.f32 %v3992_v61, %v5418_v51  ;;  %v1203_v4 = vpop.f32.mrb[5].mxu0 }
 0x18e   :  { %4853 = vpow2.f32 %v3394_v63  ;;  %v5440_v13 = vadd.f32 %v5418_v51, %v1203_v4 }
 0x18f   :  { %v3397_v14 = vmul.f32 -1.442695, %v5437_v2 }
 0x190   :  { %v3396_v11 = vmul.f32 -1.442695, %v5440_v13  ;;  %v3995_v19 = vpop.f32.mrb[6].mxu0 }
 0x191   :  { %4855 = vpow2.f32 %v3397_v14  ;;  %v5445_v6 = vadd.f32 %v3995_v19, %v5418_v51  ;;  %v1215_v50 = vpop.f32.mrb[7].mxu0 }
 0x192   :  { %4857 = vpow2.f32 %v3396_v11  ;;  %v5448_v53 = vadd.f32 %v5418_v51, %v1215_v50 }
 0x193   :  { %v4848_v55 = vpop.eup %4847  ;;  %v3399_v18 = vmul.f32 -1.442695, %v5445_v6 }
 0x194   :  { %v4850_v22 = vpop.eup %4849  ;;  %v1322_v27 = vadd.f32 1.0, %v4848_v55  ;;  %v3398_v29 = vmul.f32 -1.442695, %v5448_v53  ;;  %v3998_v7 = vpop.f32.mrb[8].mxu0 }
 0x195   :  { %v1321_v10 = vadd.f32 1.0, %v4850_v22  ;;  %4859 = vpow2.f32 %v3399_v18  ;;  %v5453_v20 = vadd.f32 %v3998_v7, %v5418_v51  ;;  %v1227_v25 = vpop.f32.mrb[9].mxu0 }
 0x196   :  { %4861 = vrcp.f32 %v1322_v27  ;;  %v5456_v26 = vadd.f32 %v5418_v51, %v1227_v25 }
 0x197   :  { %v4852_v33 = vpop.eup %4851  ;;  %4863 = vrcp.f32 %v1321_v10  ;;  %v3401_v15 = vmul.f32 -1.442695, %v5453_v20 }
 0x198   :  { %v4854_v16 = vpop.eup %4853  ;;  %v1324_v17 = vadd.f32 1.0, %v4852_v33  ;;  %4865 = vpow2.f32 %v3398_v29  ;;  %v3400_v21 = vmul.f32 -1.442695, %v5456_v26  ;;  %v4001_v30 = vpop.f32.mrb[10].mxu0 }
 0x199   :  { %v1323_v34 = vadd.f32 1.0, %v4854_v16  ;;  %4867 = vpow2.f32 %v3401_v15  ;;  %v5461_v36 = vadd.f32 %v4001_v30, %v5418_v51  ;;  %v1239_v38 = vpop.f32.mrb[11].mxu0 }
 0x19a   :  { %4869 = vrcp.f32 %v1324_v17  ;;  %v5464_v49 = vadd.f32 %v5418_v51, %v1239_v38 }
 0x19b   :  { %v4856_v58 = vpop.eup %4855  ;;  %4871 = vrcp.f32 %v1323_v34  ;;  %v3403_v5 = vmul.f32 -1.442695, %v5461_v36 }
 0x19c   :  { %v4858_v8 = vpop.eup %4857  ;;  %v1326_v24 = vadd.f32 1.0, %v4856_v58  ;;  %4873 = vpow2.f32 %v3400_v21  ;;  %v3402_v31 = vmul.f32 -1.442695, %v5464_v49  ;;  %v4004_v3 = vpop.f32.mrb[12].mxu0 }
 0x19d   :  { %v1325_v32 = vadd.f32 1.0, %v4858_v8  ;;  %4875 = vpow2.f32 %v3403_v5  ;;  %v5469_v52 = vadd.f32 %v4004_v3, %v5418_v51  ;;  %v1251_v1 = vpop.f32.mrb[13].mxu0 }
 0x19e   :  { %4877 = vrcp.f32 %v1326_v24  ;;  %v5472_v42 = vadd.f32 %v5418_v51, %v1251_v1 }
 0x19f   :  { %v4860_v43 = vpop.eup %4859  ;;  %4879 = vrcp.f32 %v1325_v32  ;;  %v3405_v46 = vmul.f32 -1.442695, %v5469_v52 }
 0x1a0   :  { %v4862_v56 = vpop.eup %4861  ;;  %v1328_v57 = vadd.f32 1.0, %v4860_v43  ;;  %4881 = vpow2.f32 %v3402_v31  ;;  %v3404_v63 = vmul.f32 -1.442695, %v5472_v42  ;;  %v4007_v61 = vpop.f32.mrb[14].mxu0 }
 0x1a1   :  { %v4864_v4 = vpop.eup %4863  ;;  %v1370_v14 = vmul.f32 %v4862_v56, %v5421_v0  ;;  %4883 = vpow2.f32 %v3405_v46  ;;  %v5478_v11 = vadd.f32 %v4007_v61, %v5418_v51  ;;  %v1263_v19 = vpop.f32.mrb[15].mxu0 }
 0x1a2   :  { %v4866_v50 = vpop.eup %4865  ;;  %v1369_v55 = vmul.f32 %v4864_v4, %v5424_v41  ;;  %4885 = vrcp.f32 %v1328_v57  ;;  %v5482_v18 = vadd.f32 %v5418_v51, %v1263_v19 }
 0x1a3   :  { %v4868_v22 = vpop.eup %4867  ;;  %v1400_v27 = vsel %vm94_vm0, %v1370_v14, 0  ;;  %v1327_v29 = vadd.f32 1.0, %v4866_v50  ;;  %4887 = vpow2.f32 %v3404_v63  ;;  %v3407_v7 = vmul.f32 -1.442695, %v5478_v11 }
 0x1a4   :  { %v4870_v0 = vpop.eup %4869  ;;  %v5486_v10 = vand.u32 4294901760, %v1400_v27  ;;  %v1397_v25 = vsel %vm94_vm0, %v1369_v55, 0  ;;  %v1330_v33 = vadd.f32 1.0, %v4868_v22  ;;  %v3406_v15 = vmul.f32 -1.442695, %v5482_v18 }
 0x1a5   :  { %v4872_v41 = vpop.eup %4871  ;;  %v5490_v16 = vand.u32 4294901760, %v1397_v25  ;;  %v1372_v51 = vmul.f32 %v4870_v0, %v5429_v54  ;;  %4889 = vrcp.f32 %v1327_v29 }
 0x1a6   :  { %v4874_v17 = vpop.eup %4873  ;;  %v5494_v21 = vsub.f32 %v1400_v27, %v5486_v10  ;;  %v1371_v30 = vmul.f32 %v4872_v41, %v5432_v60  ;;  %4891 = vrcp.f32 %v1330_v33 }
 0x1a7   :  { %v4876_v34 = vpop.eup %4875  ;;  %v1406_v38 = vsel %vm94_vm0, %v1372_v51, 0  ;;  %v1329_v58 = vadd.f32 1.0, %v4874_v17  ;;  %4893 = vpow2.f32 %v3407_v7  ;;  %v5499_v5 = vsub.f32 %v1397_v25, %v5490_v16 }
 0x1a8   :  { %v4878_v8 = vpop.eup %4877  ;;  %v5501_v24 = vand.u32 4294901760, %v1406_v38  ;;  %v1403_v54 = vsel %vm94_vm0, %v1371_v30, 0  ;;  %v1332_v31 = vadd.f32 1.0, %v4876_v34  ;;  %4895 = vpow2.f32 %v3406_v15 }
 0x1a9   :  { %v4880_v3 = vpop.eup %4879  ;;  %v5504_v32 = vand.u32 4294901760, %v1403_v54  ;;  %v1374_v60 = vmul.f32 %v4878_v8, %v5437_v2  ;;  %4897 = vrcp.f32 %v1329_v58  ;;  %v1515_v1 = vand.u32 4294901760, %v5499_v5 }
 0x1aa   :  { %v4882_v43 = vpop.eup %4881  ;;  %v5509_v46 = vsub.f32 %v1406_v38, %v5501_v24  ;;  %v1373_v56 = vmul.f32 %v4880_v3, %v5440_v13  ;;  %4899 = vrcp.f32 %v1332_v31  ;;  %v1525_v57 = vand.u32 4294901760, %v5494_v21 }
 0x1ab   :  { %v4884_v63 = vpop.eup %4883  ;;  %v5514_v61 = vsub.f32 %v1403_v54, %v5504_v32  ;;  %v1412_v4 = vsel %vm94_vm0, %v1374_v60, 0  ;;  %v1331_v14 = vadd.f32 1.0, %v4882_v43  ;;  %v1516_v2 = vsub.f32 %v5499_v5, %v1515_v1 }
 0x1ac   :  { %v4886_v19 = vpop.eup %4885  ;;  %v5520_v50 = vand.u32 4294901760, %v1412_v4  ;;  %v1409_v55 = vsel %vm94_vm0, %v1373_v56, 0  ;;  %v1334_v13 = vadd.f32 1.0, %v4884_v63  ;;  %v1526_v22 = vsub.f32 %v5494_v21, %v1525_v57 }
 0x1ad   :  { %v4888_v27 = vpop.eup %4887  ;;  %v5526_v29 = vand.u32 4294901760, %v1409_v55  ;;  %v1376_v7 = vmul.f32 %v4886_v19, %v5445_v6  ;;  %4901 = vrcp.f32 %v1331_v14  ;;  %v1517_v0 = vand.u32 4294901760, %v1516_v2 }
 0x1ae   :  { %v5530_v25 = vsub.f32 %v1412_v4, %v5520_v50  ;;  %4903 = vrcp.f32 %v1334_v13  ;;  %v1333_v33 = vadd.f32 1.0, %v4888_v27  ;;  %v1527_v15 = vand.u32 4294901760, %v1526_v22 }
 0x1af   :  { %v4890_v41 = vpop.eup %4889  ;;  %v5533_v51 = vsub.f32 %v1409_v55, %v5526_v29  ;;  %v1418_v17 = vsel %vm94_vm0, %v1376_v7, 0  ;;  %4016 = vmatprep.mubr.f32.mxu1 %v1517_v0  ;;  %v1535_v30 = vand.u32 4294901760, %v5514_v61  ;;  %v1545_v34 = vand.u32 4294901760, %v5509_v46 }
 0x1b0   :  { %v4892_v6 = vpop.eup %4891  ;;  %v5538_v38 = vand.u32 4294901760, %v1418_v17  ;;  %v1375_v58 = vmul.f32 %v4890_v41, %v5448_v53  ;;  %4905 = vrcp.f32 %v1333_v33  ;;  %4017 = vmatmul.mubr.f32.vlgmr.msra.gmra.mrb[0].mxu1 %v1527_v15  ;;  %v1565_v8 = vand.u32 4294901760, %v5530_v25 }
 0x1b1   :  { %v4894_v54 = vpop.eup %4893  ;;  %v1378_v31 = vmul.f32 %v4892_v6, %v5453_v20  ;;  %4469 = vmatpush3.bf16.msra.mxu1 %v5396_v23  ;;  %v1536_v3 = vsub.f32 %v5514_v61, %v1535_v30  ;;  %v1546_v60 = vsub.f32 %v5509_v46, %v1545_v34  ;;  %v1555_v43 = vand.u32 4294901760, %v5533_v51 }
 0x1b2   :  { %v4896_v53 = vpop.eup %4895  ;;  %v5552_v56 = vsub.f32 %v1418_v17, %v5538_v38  ;;  %v1415_v63 = vsel %vm94_vm0, %v1375_v58, 0  ;;  %v1336_v4 = vadd.f32 1.0, %v4894_v54  ;;  %v1566_v23 = vsub.f32 %v5530_v25, %v1565_v8  ;;  %4471 = vmatprep.subr.bf16.mxu1 %v5405_v35 }
 0x1b3   :  { %v4898_v20 = vpop.eup %4897  ;;  %v5559_v14 = vand.u32 4294901760, %v1415_v63  ;;  %v1424_v2 = vsel %vm94_vm0, %v1378_v31, 0  ;;  %v1335_v19 = vadd.f32 1.0, %v4896_v53  ;;  %v1537_v55 = vand.u32 4294901760, %v1536_v3 }
 0x1b4   :  { %v4900_v13 = vpop.eup %4899  ;;  %v5562_v22 = vand.u32 4294901760, %v1424_v2  ;;  %v1377_v27 = vmul.f32 %v4898_v20, %v5456_v26  ;;  %4907 = vrcp.f32 %v1336_v4  ;;  %v1547_v7 = vand.u32 4294901760, %v1546_v60 }
 0x1b5   :  { %v5566_v0 = vsub.f32 %v1415_v63, %v5559_v14  ;;  %v1380_v33 = vmul.f32 %v4900_v13, %v5461_v36  ;;  %4909 = vrcp.f32 %v1335_v19  ;;  %4019 = vmatprep.mubr.f32.mxu1 %v1537_v55  ;;  %v1556_v15 = vsub.f32 %v5533_v51, %v1555_v43  ;;  %4473 = vmatpush3.bf16.msra.mxu1 %v5405_v35 }
 0x1b6   :  { %v5574_v41 = vsub.f32 %v1424_v2, %v5562_v22  ;;  %v1421_v26 = vsel %vm94_vm0, %v1377_v27, 0  ;;  %4020 = vmatmul.mubr.f32.gmra.mrb[2].mxu1 %v1547_v7  ;;  %v1567_v17 = vand.u32 4294901760, %v1566_v23  ;;  %v1585_v6 = vand.u32 4294901760, %v5552_v56  ;;  %4475 = vmatprep.subr.bf16.mxu1 %v5409_v37 }
 0x1b7   :  { %v4902_v36 = vpop.eup %4901  ;;  %v5579_v58 = vand.u32 4294901760, %v1421_v26  ;;  %v1430_v54 = vsel %vm94_vm0, %v1380_v33, 0  ;;  %v1557_v31 = vand.u32 4294901760, %v1556_v15  ;;  %v1575_v3 = vand.u32 4294901760, %v5566_v0 }
 0x1b8   :  { %v4904_v35 = vpop.eup %4903  ;;  %v5583_v60 = vand.u32 4294901760, %v1430_v54  ;;  %v1379_v53 = vmul.f32 %v4902_v36, %v5464_v49  ;;  %v1586_v63 = vsub.f32 %v5552_v56, %v1585_v6  ;;  %v6149_v4 = vand.u32 4294901760, %v5574_v41 }
 0x1b9   :  { %v5591_v23 = vsub.f32 %v1421_v26, %v5579_v58  ;;  %v1382_v20 = vmul.f32 %v4904_v35, %v5469_v52  ;;  %4022 = vmatprep.mubr.f32.mxu1 %v1557_v31  ;;  %v1576_v2 = vsub.f32 %v5566_v0, %v1575_v3 }
 0x1ba   :  { %v4906_v19 = vpop.eup %4905  ;;  %v5598_v55 = vsub.f32 %v1430_v54, %v5583_v60  ;;  %v1427_v49 = vsel %vm94_vm0, %v1379_v53, 0  ;;  %4023 = vmatmul.mubr.f32.gmra.mrb[4].mxu1 %v1567_v17  ;;  %v1587_v15 = vand.u32 4294901760, %v1586_v63  ;;  %v1606_v36 = vsub.f32 %v5574_v41, %v6149_v4 }
 0x1bb   :  { %v5601_v13 = vand.u32 4294901760, %v1427_v49  ;;  %v1436_v27 = vsel %vm94_vm0, %v1382_v20, 0  ;;  %v1381_v7 = vmul.f32 %v4906_v19, %v5472_v42  ;;  %v1577_v33 = vand.u32 4294901760, %v1576_v2 }
 0x1bc   :  { %v5605_v52 = vand.u32 4294901760, %v1436_v27  ;;  %v6150_v26 = vand.u32 4294901760, %v5591_v23  ;;  %v6151_v31 = vand.u32 4294901760, %v5598_v55  ;;  %v6157_v45 = vand.u32 4294901760, %v5591_v23 }
 0x1bd   :  { %v5612_v54 = vsub.f32 %v1427_v49, %v5601_v13  ;;  %v1433_v17 = vsel %vm94_vm0, %v1381_v7, 0  ;;  %4025 = vmatprep.mubr.f32.mxu1 %v1577_v33  ;;  %v6160_v59 = vand.u32 4294901760, %v5598_v55 }
 0x1be   :  { %v4908_v35 = vpop.eup %4907  ;;  %v5617_v42 = vsub.f32 %v1436_v27, %v5605_v52  ;;  %v5619_v53 = vand.u32 4294901760, %v1433_v17  ;;  %4026 = vmatmul.mubr.f32.gmra.mrb[6].mxu1 %v1587_v15  ;;  %v1596_v63 = vsub.f32 %v5591_v23, %v6150_v26  ;;  %v1607_v27 = vand.u32 4294901760, %v1606_v36 }
 0x1bf   :  { %v4910_v20 = vpop.eup %4909  ;;  %v1384_v2 = vmul.f32 %v4908_v35, %v5478_v11  ;;  %v6152_v19 = vand.u32 4294901760, %v5612_v54  ;;  %v1626_v26 = vsub.f32 %v5598_v55, %v6151_v31 }
 0x1c0   :  { %v5627_v49 = vsub.f32 %v1433_v17, %v5619_v53  ;;  %v1383_v7 = vmul.f32 %v4910_v20, %v5482_v18  ;;  %v1597_v33 = vand.u32 4294901760, %v1596_v63  ;;  %v1645_v11 = vand.u32 4294901760, %v5617_v42 }
 0x1c1   :  { %v1442_v4 = vsel %vm94_vm0, %v1384_v2, 0  ;;  %v1616_v15 = vsub.f32 %v5612_v54, %v6152_v19  ;;  %v1627_v19 = vand.u32 4294901760, %v1626_v26 }
 0x1c2   :  { %v5638_v35 = vand.u32 4294901760, %v1442_v4  ;;  %v1439_v17 = vsel %vm94_vm0, %v1383_v7, 0  ;;  %4028 = vmatprep.mubr.f32.mxu1 %v1597_v33  ;;  %v6153_v18 = vand.u32 4294901760, %v5627_v49  ;;  %v1646_v7 = vsub.f32 %v5617_v42, %v1645_v11 }
 0x1c3   :  { %v5642_v36 = vand.u32 4294901760, %v1439_v17  ;;  %4029 = vmatmul.mubr.f32.gmra.mrb[8].mxu1 %v1607_v27  ;;  %v1617_v63 = vand.u32 4294901760, %v1616_v15  ;;  %v6161_v62 = vand.u32 4294901760, %v5627_v49 }
 0x1c4   :  { %v5645_v20 = vsub.f32 %v1442_v4, %v5638_v35  ;;  %v1636_v2 = vsub.f32 %v5627_v49, %v6153_v18  ;;  %v1647_v15 = vand.u32 4294901760, %v1646_v7 }
 0x1c5   :  { %v5651_v31 = vsub.f32 %v1439_v17, %v5642_v36  ;;  %4031 = vmatprep.mubr.f32.mxu1 %v1617_v63 }
 0x1c6   :  { %v1637_v33 = vand.u32 4294901760, %v1636_v2  ;;  %v1665_v27 = vand.u32 4294901760, %v5645_v20 }
 0x1c7   :  { %4032 = vmatmul.mubr.f32.gmra.mrb[10].mxu1 %v1627_v19  ;;  %v1655_v4 = vand.u32 4294901760, %v5651_v31 }
 0x1c8   :  { %4034 = vmatprep.mubr.f32.mxu1 %v1637_v33  ;;  %v1666_v26 = vsub.f32 %v5645_v20, %v1665_v27 }
 0x1c9   :  { %v1656_v18 = vsub.f32 %v5651_v31, %v1655_v4 }
 0x1ca   :  { %v1667_v63 = vand.u32 4294901760, %v1666_v26 }
 0x1cb   :  { %4035 = vmatmul.mubr.f32.gmra.mrb[12].mxu1 %v1647_v15  ;;  %v1657_v17 = vand.u32 4294901760, %v1656_v18 }
 0x1cd   :  { %4037 = vmatprep.mubr.f32.mxu1 %v1657_v17 }
 0x1cf   :  { %4038 = vmatmul.mubr.f32.gmra.mrb[14].mxu1 %v1667_v63 }
 0x1d0   :  { %4048 = vmatprep.mubr.f32.mxu1 %v5490_v16 }
 0x1d3   :  { %4049 = vmatmul.mubr.f32.vlgmr.msra.gmra.mrb[0].mxu1 %v5486_v10 }
 0x1d4   :  { %4051 = vmatprep.mubr.f32.mxu1 %v5504_v32  ;;  %4477 = vmatpush3.bf16.msra.mxu1 %v5409_v37  ;;  %v3409_v37 = vld [vmem:[%s6139_s0] ss:$0 sm:$0xff]  ;;  %s4939_s0 = smov [#allocation3]  }
 0x1d5   :  { %4479 = vmatprep.subr.bf16.mxu1 %v5413_v44  ;;  %2582 = vbcast.lane.b32.xlu0 %v3409_v37, 256  ;;  %s3374_s20 = sshll.u32 %s4939_s0, 4  ;;  %s3375_s20 = int_to_ptr.vmem [resolvable:$true] %s3374_s20 }
 0x1d6   :  { %2590 = vbcast.lane.b32.xlu1 %v3409_v37, 272  ;;  %s4911_s21 = scalar_lea.vmem %s3375_s20, 16  ;;  %s4915_s22 = scalar_lea.vmem %s3375_s20, 32 }
 0x1d7   :  { %4052 = vmatmul.mubr.f32.gmra.mrb[2].mxu1 %v5501_v24  ;;  %p4912_p0 = scmp.ne.s32.totalorder %s3375_s20, %s4911_s21  ;;  %p4916_p1 = scmp.lt.s32.totalorder %s3375_s20, %s3375_s20 }
 0x1d8   :  { %4054 = vmatprep.mubr.f32.mxu1 %v5526_v29  ;;  %4481 = vmatpush3.bf16.msra.mxu1 %v5413_v44  ;;  %v4490_v44 = vpack.c.bf16 %v1683_v48, %v1676_v47  ;;  %v6158_v47 = vand.u32 4294901760, %v5574_v41  ;;  %v6159_v48 = vand.u32 4294901760, %v5612_v54  ;;  %p4917_p2 = scmp.lt.s32.totalorder %s4915_s22, %s4911_s21 }
 0x1d9   :  { %4483 = vmatprep.subr.bf16.mxu1 %v5364_v28  ;;  %2586 = vbcast.lane.b32.xlu0 %v3409_v37, 264 }
 0x1da   :  { %2594 = vbcast.lane.b32.xlu1 %v3409_v37, 280  ;;  %p4918_p3 = por %p4917_p2, %p4916_p1 }
 0x1db   :  { %4055 = vmatmul.mubr.f32.gmra.mrb[4].mxu1 %v5520_v50 }
 0x1dc   :  { %4057 = vmatprep.mubr.f32.mxu1 %v5559_v14  ;;  %p4919_p4 = pnand %p4918_p3, %p4912_p0 }
 0x1dd   :  { %2598 = vbcast.lane.b32.xlu0 %v3409_v37, 288 }
 0x1de   :  { %2602 = vbcast.lane.b32.xlu1 %v3409_v37, 296 }
 0x1df   :  { %4058 = vmatmul.mubr.f32.gmra.mrb[6].mxu1 %v5538_v38 }
 0x1e0   :  { %4060 = vmatprep.mubr.f32.mxu1 %v5579_v58 }
 0x1e1   :  { %2606 = vbcast.lane.b32.xlu0 %v3409_v37, 304 }
 0x1e2   :  { %2610 = vbcast.lane.b32.xlu1 %v3409_v37, 312 }
 0x1e3   :  { %4061 = vmatmul.mubr.f32.gmra.mrb[8].mxu1 %v5562_v22 }
 0x1e4   :  { %4063 = vmatprep.mubr.f32.mxu1 %v5601_v13 }
 0x1e5   :  { %2614 = vbcast.lane.b32.xlu0 %v3409_v37, 320 }
 0x1e6   :  { %2618 = vbcast.lane.b32.xlu1 %v3409_v37, 328 }
 0x1e7   :  { %4064 = vmatmul.mubr.f32.gmra.mrb[10].mxu1 %v5583_v60 }
 0x1e8   :  { %4066 = vmatprep.mubr.f32.mxu1 %v5619_v53 }
 0x1e9   :  { %2622 = vbcast.lane.b32.xlu0 %v3409_v37, 336 }
 0x1ea   :  { %2626 = vbcast.lane.b32.xlu1 %v3409_v37, 344 }
 0x1eb   :  { %4067 = vmatmul.mubr.f32.gmra.mrb[12].mxu1 %v5605_v52 }
 0x1ec   :  { %4069 = vmatprep.mubr.f32.mxu1 %v5642_v36 }
 0x1ed   :  { %2630 = vbcast.lane.b32.xlu0 %v3409_v37, 352 }
 0x1ee   :  { %2634 = vbcast.lane.b32.xlu1 %v3409_v37, 360 }
 0x1ef   :  { %4070 = vmatmul.mubr.f32.gmra.mrb[14].mxu1 %v5638_v35 }
 0x1f0   :  { %4080 = vmatprep.mubr.f32.mxu1 %v5499_v5 }
 0x1f1   :  { %2638 = vbcast.lane.b32.xlu0 %v3409_v37, 368 }
 0x1f2   :  { %2642 = vbcast.lane.b32.xlu1 %v3409_v37, 376 }
 0x1f3   :  { %4081 = vmatmul.mubr.f32.vlgmr.msra.gmra.mrb[0].mxu1 %v5494_v21 }
 0x1f4   :  { %4083 = vmatprep.mubr.f32.mxu1 %v5514_v61  ;;  %4485 = vmatpush3.bf16.msra.mxu1 %v5364_v28 }
 0x1f5   :  { %4487 = vmatprep.subr.bf16.mxu1 %v5374_v39 }
 0x1f7   :  { %4084 = vmatmul.mubr.f32.gmra.mrb[2].mxu1 %v5509_v46 }
 0x1f8   :  { %4086 = vmatprep.mubr.f32.mxu1 %v5533_v51  ;;  %4489 = vmatpush3.bf16.msra.mxu1 %v5374_v39 }
 0x1f9   :  { %4491 = vmatprep.subr.bf16.mxu1 %v4490_v44 }
 0x1fb   :  { %4087 = vmatmul.mubr.f32.gmra.mrb[4].mxu1 %v5530_v25 }
 0x1fc   :  { %4089 = vmatprep.mubr.f32.mxu1 %v5566_v0 }
 0x1ff   :  { %4090 = vmatmul.mubr.f32.gmra.mrb[6].mxu1 %v5552_v56 }
 0x200   :  { %4092 = vmatprep.mubr.f32.mxu1 %v5591_v23 }
 0x203   :  { %4093 = vmatmul.mubr.f32.gmra.mrb[8].mxu1 %v5574_v41 }
 0x204   :  { %4095 = vmatprep.mubr.f32.mxu1 %v5612_v54 }
 0x207   :  { %4096 = vmatmul.mubr.f32.gmra.mrb[10].mxu1 %v5598_v55 }
 0x208   :  { %4098 = vmatprep.mubr.f32.mxu1 %v5627_v49 }
 0x20b   :  { %4099 = vmatmul.mubr.f32.gmra.mrb[12].mxu1 %v5617_v42 }
 0x20c   :  { %4101 = vmatprep.mubr.f32.mxu1 %v5651_v31 }
 0x20f   :  { %4102 = vmatmul.mubr.f32.gmra.mrb[14].mxu1 %v5645_v20 }
 0x210   :  { %4112 = vmatprep.mubr.f32.mxu1 %v1515_v1 }
 0x213   :  { %4113 = vmatmul.mubr.f32.vlgmr.msra.gmra.mrb[0].mxu1 %v1525_v57 }
 0x214   :  { %4115 = vmatprep.mubr.f32.mxu1 %v1535_v30  ;;  %4493 = vmatpush3.bf16.msra.mxu1 %v4490_v44  ;;  %v4936_v30 = vmov 0.0|0.0  }
 0x215   :  { %4495 = vmatprep.subr.bf16.mxu1 %v4494_v40  ;;  %4506 = vmatprep.subr.bf16.mxu0 %v4936_v30 }
 0x217   :  { %4116 = vmatmul.mubr.f32.gmra.mrb[2].mxu1 %v1545_v34 }
 0x218   :  { %4118 = vmatprep.mubr.f32.mxu1 %v1555_v43  ;;  %4497 = vmatpush3.bf16.msra.mxu1 %v4494_v40 }
 0x219   :  { %4499 = vmatprep.subr.bf16.mxu1 %v5364_v28 }
 0x21b   :  { %4119 = vmatmul.mubr.f32.gmra.mrb[4].mxu1 %v1565_v8  ;;  %v4937_v8 = vmov 1.0|1.0  }
 0x21c   :  { %4121 = vmatprep.mubr.f32.mxu1 %v1575_v3 }
 0x21f   :  { %4122 = vmatmul.mubr.f32.gmra.mrb[6].mxu1 %v1585_v6 }
 0x220   :  { %4124 = vmatprep.mubr.f32.mxu1 %v6157_v45 }
 0x223   :  { %4125 = vmatmul.mubr.f32.gmra.mrb[8].mxu1 %v6158_v47 }
 0x224   :  { %4127 = vmatprep.mubr.f32.mxu1 %v6159_v48 }
 0x227   :  { %4128 = vmatmul.mubr.f32.gmra.mrb[10].mxu1 %v6160_v59 }
 0x228   :  { %4130 = vmatprep.mubr.f32.mxu1 %v6161_v62 }
 0x22b   :  { %4131 = vmatmul.mubr.f32.gmra.mrb[12].mxu1 %v1645_v11 }
 0x22c   :  { %4133 = vmatprep.mubr.f32.mxu1 %v1655_v4 }
 0x22f   :  { %4134 = vmatmul.mubr.f32.gmra.mrb[14].mxu1 %v1665_v27 }
 0x230   :  { %4144 = vmatprep.mubr.f32.mxu1 %v5490_v16 }
 0x233   :  { %4145 = vmatmul.mubr.f32.vlgmr.msra.gmra.mrb[0].mxu1 %v5486_v10 }
 0x234   :  { %4147 = vmatprep.mubr.f32.mxu1 %v5504_v32  ;;  %4501 = vmatpush3.bf16.msra.mxu1 %v5364_v28  ;;  %v2575_v28 = vlaneseq }
 0x235   :  { %4503 = vmatprep.subr.bf16.mxu1 %v5374_v39 }
 0x236   :  { %v5783_v12 = vand.u32 127, %v2575_v28 }
 0x237   :  { %4148 = vmatmul.mubr.f32.gmra.mrb[2].mxu1 %v5501_v24 }
 0x238   :  { %4150 = vmatprep.mubr.f32.mxu1 %v5526_v29  ;;  %4505 = vmatpush3.bf16.msra.mxu1 %v5374_v39 }
 0x239   :  { %4530 = vmatprep.subr.bf16.mxu1 %v4936_v30 }
 0x23b   :  { %4151 = vmatmul.mubr.f32.gmra.mrb[4].mxu1 %v5520_v50 }
 0x23c   :  { %4153 = vmatprep.mubr.f32.mxu1 %v5559_v14 }
 0x23f   :  { %4154 = vmatmul.mubr.f32.gmra.mrb[6].mxu1 %v5538_v38 }
 0x240   :  { %4156 = vmatprep.mubr.f32.mxu1 %v5579_v58 }
 0x243   :  { %4157 = vmatmul.mubr.f32.gmra.mrb[8].mxu1 %v5562_v22 }
 0x244   :  { %4159 = vmatprep.mubr.f32.mxu1 %v5601_v13 }
 0x247   :  { %4160 = vmatmul.mubr.f32.gmra.mrb[10].mxu1 %v5583_v60  ;;  %v2583_v39 = vpop.permute.xlu0 %2582 }
 0x248   :  { %4162 = vmatprep.mubr.f32.mxu1 %v5619_v53  ;;  %vm2644_vm1 = vcmp.eq.s32.totalorder %v2583_v39, %v5783_v12 }
 0x249   :  { %v3410_v21 = vsel %vm2644_vm1, 1.0, %v4935_v9 }
 0x24a   :  { %v5789_v5 = vsub.f32 %v3410_v21, %v3410_v21 }
 0x24b   :  { %4163 = vmatmul.mubr.f32.gmra.mrb[12].mxu1 %v5605_v52 }
 0x24c   :  { %4165 = vmatprep.mubr.f32.mxu1 %v5642_v36  ;;  %v2819_v61 = vand.u32 4294901760, %v5789_v5 }
 0x24e   :  { %v2820_v34 = vsub.f32 %v5789_v5, %v2819_v61 }
 0x24f   :  { %4166 = vmatmul.mubr.f32.gmra.mrb[14].mxu1 %v5638_v35 }
 0x250   :  { %4176 = vmatprep.mubr.f32.mxu1 %v5490_v16  ;;  %v2587_v16 = vpop.permute.xlu0 %2586  ;;  %v2821_v0 = vand.u32 4294901760, %v2820_v34 }
 0x251   :  { %vm2645_vm3 = vcmp.eq.s32.totalorder %v2587_v16, %v5783_v12 }
 0x252   :  { %vm5797_vm4 = vmpackc.low %vm2645_vm3, %vm2644_vm1 }
 0x253   :  { %4177 = vmatmul.mubr.f32.vlgmr.msra.gmra.mrb[0].mxu1 %v5486_v10  ;;  %v2591_v10 = vpop.permute.xlu1 %2590  ;;  %4508 = vmatpush3.bf16.msk.msra.mxu0 %vm5797_vm4, %v4937_v8 }
 0x254   :  { %4179 = vmatprep.mubr.f32.mxu1 %v5504_v32  ;;  %vm2646_vm2 = vcmp.eq.s32.totalorder %v2591_v10, %v5783_v12  ;;  %v3411_v32 = vsel %vm2645_vm3, 1.0, %v4935_v9  ;;  %4509 = vmatprep.subr.bf16.mxu0 %v4936_v30  ;;  %v2599_v6 = vpop.permute.xlu0 %2598 }
 0x255   :  { %v5801_v57 = vsub.f32 %v3411_v32, %v3411_v32  ;;  %vm2648_vm8 = vcmp.eq.s32.totalorder %v2599_v6, %v5783_v12 }
 0x257   :  { %4180 = vmatmul.mubr.f32.gmra.mrb[2].mxu1 %v5501_v24  ;;  %v3412_v24 = vsel %vm2646_vm2, 1.0, %v4935_v9  ;;  %v2826_v25 = vand.u32 4294901760, %v5801_v57  ;;  %v4555_v51 = vpack.c.bf16 %v5801_v57, %v5789_v5 }
 0x258   :  { %4182 = vmatprep.mubr.f32.mxu1 %v5526_v29  ;;  %v5795_v1 = vsub.f32 %v3412_v24, %v3412_v24  ;;  %v2607_v49 = vpop.permute.xlu0 %2606 }
 0x259   :  { %v2827_v56 = vsub.f32 %v5801_v57, %v2826_v25  ;;  %v5851_v11 = vpack.c.bf16 %v2826_v25, %v2819_v61  ;;  %vm2650_vm11 = vcmp.eq.s32.totalorder %v2607_v49, %v5783_v12 }
 0x25a   :  { %v2833_v29 = vand.u32 4294901760, %v5795_v1  ;;  %v3416_v33 = vsel %vm2650_vm11, 1.0, %v4935_v9 }
 0x25b   :  { %4183 = vmatmul.mubr.f32.gmra.mrb[4].mxu1 %v5520_v50  ;;  %v2595_v50 = vpop.permute.xlu1 %2594  ;;  %v5874_v17 = vsub.f32 %v3416_v33, %v3416_v33 }
 0x25c   :  { %4185 = vmatprep.mubr.f32.mxu1 %v5559_v14  ;;  %vm2647_vm5 = vcmp.eq.s32.totalorder %v2595_v50, %v5783_v12  ;;  %v2834_v43 = vsub.f32 %v5795_v1, %v2833_v29  ;;  %v2615_v37 = vpop.permute.xlu0 %2614 }
 0x25d   :  { %vm5822_vm6 = vmpackc.low %vm2647_vm5, %vm2646_vm2  ;;  %vm2652_vm14 = vcmp.eq.s32.totalorder %v2615_v37, %v5783_v12  ;;  %v2861_v47 = vand.u32 4294901760, %v5874_v17 }
 0x25e   :  { %v2835_v23 = vand.u32 4294901760, %v2834_v43  ;;  %4511 = vmatpush3.bf16.msk.msra.mxu0 %vm5822_vm6, %v4937_v8  ;;  %v3418_v28 = vsel %vm2652_vm14, 1.0, %v4935_v9 }
 0x25f   :  { %4186 = vmatmul.mubr.f32.gmra.mrb[6].mxu1 %v5538_v38  ;;  %v3413_v38 = vsel %vm2647_vm5, 1.0, %v4935_v9  ;;  %v2603_v41 = vpop.permute.xlu1 %2602  ;;  %4512 = vmatprep.subr.bf16.mxu0 %v4936_v30  ;;  %v2862_v10 = vsub.f32 %v5874_v17, %v2861_v47  ;;  %v5897_v21 = vsub.f32 %v3418_v28, %v3418_v28 }
 0x260   :  { %4188 = vmatprep.mubr.f32.mxu1 %v5579_v58  ;;  %v2828_v58 = vand.u32 4294901760, %v2827_v56  ;;  %vm2649_vm7 = vcmp.eq.s32.totalorder %v2603_v41, %v5783_v12  ;;  %v2623_v32 = vpop.permute.xlu0 %2622 }
 0x261   :  { %vm5842_vm9 = vmpackc.low %vm2649_vm7, %vm2648_vm8  ;;  %vm2654_vm1 = vcmp.eq.s32.totalorder %v2623_v32, %v5783_v12  ;;  %v2863_v34 = vand.u32 4294901760, %v2862_v10  ;;  %v2875_v43 = vand.u32 4294901760, %v5897_v21 }
 0x262   :  { %v4531_v31 = vpack.c.bf16 %v2828_v58, %v2821_v0  ;;  %4514 = vmatpush3.bf16.msk.msra.mxu0 %vm5842_vm9, %v4937_v8  ;;  %v3420_v41 = vsel %vm2654_vm1, 1.0, %v4935_v9 }
 0x263   :  { %4189 = vmatmul.mubr.f32.gmra.mrb[8].mxu1 %v5562_v22  ;;  %v5826_v22 = vsub.f32 %v3413_v38, %v3413_v38  ;;  %v2611_v19 = vpop.permute.xlu1 %2610  ;;  %4515 = vmatprep.subr.bf16.mxu0 %v4936_v30 }
 0x264   :  { %4191 = vmatprep.mubr.f32.mxu1 %v5601_v13  ;;  %v3415_v13 = vsel %vm2649_vm7, 1.0, %v4935_v9  ;;  %vm2651_vm10 = vcmp.eq.s32.totalorder %v2611_v19, %v5783_v12  ;;  %4532 = vmatpush3.bf16.msra.mxu1 %v4531_v31  ;;  %v2631_v31 = vpop.permute.xlu0 %2630 }
 0x265   :  { %v2840_v3 = vand.u32 4294901760, %v5826_v22  ;;  %v5847_v42 = vsub.f32 %v3415_v13, %v3415_v13  ;;  %v3417_v2 = vsel %vm2651_vm10, 1.0, %v4935_v9  ;;  %4533 = vmatprep.subr.bf16.mxu1 %v4936_v30  ;;  %vm5867_vm12 = vmpackc.low %vm2651_vm10, %vm2650_vm11  ;;  %v5922_v13 = vsub.f32 %v3420_v41, %v3420_v41 }
 0x266   :  { %v5864_v7 = vsub.f32 %v3417_v2, %v3417_v2  ;;  %4517 = vmatpush3.bf16.msk.msra.mxu0 %vm5867_vm12, %v4937_v8  ;;  %vm2656_vm5 = vcmp.eq.s32.totalorder %v2631_v31, %v5783_v12 }
 0x267   :  { %4192 = vmatmul.mubr.f32.gmra.mrb[10].mxu1 %v5583_v60  ;;  %v4558_v60 = vpack.c.bf16 %v5826_v22, %v5795_v1  ;;  %v2841_v55 = vsub.f32 %v5826_v22, %v2840_v3  ;;  %v2854_v18 = vand.u32 4294901760, %v5847_v42  ;;  %v2619_v63 = vpop.permute.xlu1 %2618  ;;  %4518 = vmatprep.subr.bf16.mxu0 %v4936_v30  ;;  %v2889_v2 = vand.u32 4294901760, %v5922_v13 }
 0x268   :  { %4194 = vmatprep.mubr.f32.mxu1 %v5619_v53  ;;  %v2868_v44 = vand.u32 4294901760, %v5864_v7  ;;  %vm2653_vm13 = vcmp.eq.s32.totalorder %v2619_v63, %v5783_v12  ;;  %v4564_v48 = vpack.c.bf16 %v5864_v7, %v5874_v17 }
 0x269   :  { %v2855_v15 = vsub.f32 %v5847_v42, %v2854_v18  ;;  %v3419_v62 = vsel %vm2653_vm13, 1.0, %v4935_v9  ;;  %vm5889_vm15 = vmpackc.low %vm2653_vm13, %vm2652_vm14  ;;  %v2890_v37 = vsub.f32 %v5922_v13, %v2889_v2  ;;  %vm4938_vm13 = vmmov 0  }
 0x26a   :  { %v2869_v59 = vsub.f32 %v5864_v7, %v2868_v44  ;;  %v5895_v16 = vsub.f32 %v3419_v62, %v3419_v62  ;;  %4520 = vmatpush3.bf16.msk.msra.mxu0 %vm5889_vm15, %v4937_v8  ;;  %v5926_v49 = vpack.c.bf16 %v2868_v44, %v2861_v47  ;;  %v2639_v47 = vpop.permute.xlu0 %2638  ;;  %4232 = vmatprep.mubr.msk.f32.mxu0 %vm4938_vm13, %v4935_v9  ;;  %v2692_v7 = vld [vmem:[#allocation3] sm:$0x1] }
 0x26b   :  { %4195 = vmatmul.mubr.f32.gmra.mrb[12].mxu1 %v5605_v52  ;;  %v3414_v52 = vsel %vm2648_vm8, 1.0, %v4935_v9  ;;  %v2856_v40 = vand.u32 4294901760, %v2855_v15  ;;  %v2627_v24 = vpop.permute.xlu1 %2626  ;;  %4521 = vmatprep.subr.bf16.mxu0 %v4936_v30  ;;  %v3422_v15 = vsel %vm2656_vm5, 1.0, %v4935_v9  ;;  %vm2658_vm10 = vcmp.eq.s32.totalorder %v2639_v47, %v5783_v12 }
 0x26c   :  { %4197 = vmatprep.mubr.f32.mxu1 %v5642_v36  ;;  %v5849_v53 = vsub.f32 %v3414_v52, %v3414_v52  ;;  %v2870_v50 = vand.u32 4294901760, %v2869_v59  ;;  %vm2655_vm0 = vcmp.eq.s32.totalorder %v2627_v24, %v5783_v12  ;;  %v2882_v38 = vand.u32 4294901760, %v5895_v16 }
 0x26d   :  { %v4567_v56 = vpack.c.bf16 %v5895_v16, %v5897_v21  ;;  %v3421_v0 = vsel %vm2655_vm0, 1.0, %v4935_v9  ;;  %vm5912_vm2 = vmpackc.low %vm2655_vm0, %vm2654_vm1  ;;  %v2891_v10 = vand.u32 4294901760, %v2890_v37 }
 0x26e   :  { %v2847_v36 = vand.u32 4294901760, %v5849_v53  ;;  %v4561_v20 = vpack.c.bf16 %v5847_v42, %v5849_v53  ;;  %v2883_v58 = vsub.f32 %v5895_v16, %v2882_v38  ;;  %v4540_v19 = vpack.c.bf16 %v2870_v50, %v2863_v34  ;;  %4523 = vmatpush3.bf16.msk.msra.mxu0 %vm5912_vm2, %v4937_v8 }
 0x26f   :  { %4198 = vmatmul.mubr.f32.gmra.mrb[14].mxu1 %v5638_v35  ;;  %v2842_v35 = vand.u32 4294901760, %v2841_v55  ;;  %v5920_v55 = vsub.f32 %v3421_v0, %v3421_v0  ;;  %v2635_v52 = vpop.permute.xlu1 %2634  ;;  %4524 = vmatprep.subr.bf16.mxu0 %v4936_v30  ;;  %v5951_v62 = vpack.c.bf16 %v2882_v38, %v2875_v43 }
 0x270   :  { %v2848_v26 = vsub.f32 %v5849_v53, %v2847_v36  ;;  %v5901_v25 = vpack.c.bf16 %v2854_v18, %v2847_v36  ;;  %vm2657_vm3 = vcmp.eq.s32.totalorder %v2635_v52, %v5783_v12  ;;  %4267 = vmatprep.mubr.msk.f32.mxu1 %vm4938_vm13, %v4935_v9 }
 0x271   :  { %v4534_v4 = vpack.c.bf16 %v2842_v35, %v2835_v23  ;;  %v2876_v23 = vsub.f32 %v5897_v21, %v2875_v43  ;;  %v2884_v35 = vand.u32 4294901760, %v2883_v58  ;;  %v2896_v36 = vand.u32 4294901760, %v5920_v55  ;;  %vm5937_vm7 = vmpackc.low %vm2657_vm3, %vm2656_vm5 }
 0x272   :  { %v2849_v45 = vand.u32 4294901760, %v2848_v26  ;;  %v4570_v33 = vpack.c.bf16 %v5920_v55, %v5922_v13  ;;  %4526 = vmatpush3.bf16.msk.msra.mxu0 %vm5937_vm7, %v4937_v8 }
 0x273   :  { %4535 = vmatpush3.bf16.msra.mxu1 %v4534_v4  ;;  %v2877_v18 = vand.u32 4294901760, %v2876_v23  ;;  %v3423_v4 = vsel %vm2657_vm3, 1.0, %v4935_v9  ;;  %v2897_v63 = vsub.f32 %v5920_v55, %v2896_v36  ;;  %4527 = vmatprep.subr.bf16.mxu0 %v4936_v30  ;;  %v5974_v23 = vpack.c.bf16 %v2896_v36, %v2889_v2 }
 0x274   :  { %4536 = vmatprep.subr.bf16.mxu1 %v4936_v30  ;;  %v4537_v61 = vpack.c.bf16 %v2856_v40, %v2849_v45  ;;  %v5944_v44 = vsub.f32 %v3423_v4, %v3423_v4  ;;  %v5946_v40 = vsub.f32 %v3422_v15, %v3422_v15  ;;  %v2643_v45 = vpop.permute.xlu1 %2642 }
 0x275   :  { %vm2659_vm8 = vcmp.eq.s32.totalorder %v2643_v45, %v5783_v12  ;;  %v4543_v59 = vpack.c.bf16 %v2884_v35, %v2877_v18  ;;  %v2898_v28 = vand.u32 4294901760, %v2897_v63  ;;  %v3424_v12 = vsel %vm2658_vm10, 1.0, %v4935_v9 }
 0x276   :  { %v2910_v24 = vand.u32 4294901760, %v5944_v44  ;;  %v2903_v32 = vand.u32 4294901760, %v5946_v40  ;;  %v3425_v50 = vsel %vm2659_vm8, 1.0, %v4935_v9  ;;  %vm5962_vm11 = vmpackc.low %vm2659_vm8, %vm2658_vm10  ;;  %v5971_v41 = vsub.f32 %v3424_v12, %v3424_v12 }
 0x277   :  { %4538 = vmatpush3.bf16.msra.mxu1 %v4537_v61  ;;  %v4573_v61 = vpack.c.bf16 %v5944_v44, %v5946_v40  ;;  %v5969_v0 = vsub.f32 %v3425_v50, %v3425_v50  ;;  %v4546_v58 = vpack.c.bf16 %v2898_v28, %v2891_v10  ;;  %4529 = vmatpush3.bf16.msk.msra.mxu0 %vm5962_vm11, %v4937_v8  ;;  %v3408_v28 = vld [vmem:[#allocation2] ss:$0 sm:$0xff] }
 0x278   :  { %4539 = vmatprep.subr.bf16.mxu1 %v4936_v30  ;;  %v2911_v38 = vsub.f32 %v5944_v44, %v2910_v24  ;;  %v2904_v43 = vsub.f32 %v5946_v40, %v2903_v32  ;;  %v2917_v35 = vand.u32 4294901760, %v5971_v41  ;;  %4554 = vmatprep.subr.bf16.mxu0 %v4936_v30  ;;  %v5987_v15 = vpack.c.bf16 %v2910_v24, %v2903_v32 }
 0x279   :  { %v4576_v18 = vpack.c.bf16 %v5969_v0, %v5971_v41 }
 0x27a   :  { %v2912_v52 = vand.u32 4294901760, %v2911_v38  ;;  %v2905_v31 = vand.u32 4294901760, %v2904_v43  ;;  %v2918_v36 = vsub.f32 %v5971_v41, %v2917_v35 }
 0x27b   :  { %4541 = vmatpush3.bf16.msra.mxu1 %v4540_v19  ;;  %v2924_v19 = vand.u32 4294901760, %v5969_v0 }
 0x27c   :  { %4542 = vmatprep.subr.bf16.mxu1 %v4936_v30  ;;  %v4549_v2 = vpack.c.bf16 %v2912_v52, %v2905_v31  ;;  %v2919_v37 = vand.u32 4294901760, %v2918_v36 }
 0x27d   :  { %v2925_v4 = vsub.f32 %v5969_v0, %v2924_v19  ;;  %v5990_v47 = vpack.c.bf16 %v2924_v19, %v2917_v35 }
 0x27f   :  { %4544 = vmatpush3.bf16.msra.mxu1 %v4543_v59  ;;  %v2926_v63 = vand.u32 4294901760, %v2925_v4  ;;  %v5997_v59 = vpack.c.bf16 %v2840_v3, %v2833_v29 }
 0x280   :  { %4545 = vmatprep.subr.bf16.mxu1 %v4936_v30 }
 0x281   :  { %v4552_v45 = vpack.c.bf16 %v2926_v63, %v2919_v37 }
 0x283   :  { %4547 = vmatpush3.bf16.msra.mxu1 %v4546_v58 }
 0x284   :  { %4548 = vmatprep.subr.bf16.mxu1 %v4936_v30 }
 0x287   :  { %4550 = vmatpush3.bf16.msra.mxu1 %v4549_v2 }
 0x288   :  { %4551 = vmatprep.subr.bf16.mxu1 %v4936_v30 }
 0x28b   :  { %4553 = vmatpush3.bf16.msra.mxu1 %v4552_v45 }
 0x28c   :  { %4578 = vmatprep.subr.bf16.mxu1 %v4936_v30 }
 0x326   :  { %v4178_v10 = vpop.f32.mrb[0].mxu1 }
 0x327   :  { %v2480_v24 = vpop.f32.mrb[1].mxu1  ;;  %v4666_v38 = vadd.f32 %v4178_v10, %v3408_v28 }
 0x328   :  { %v4667_v32 = vadd.f32 %v3408_v28, %v2480_v24 }
 0x32a   :  { %v4181_v50 = vpop.f32.mrb[2].mxu1  ;;  %2693 = vxpose.xlu0.b32.start [1/16] (narrow) %v4667_v32, 8 }
 0x32b   :  { %v2492_v12 = vpop.f32.mrb[3].mxu1  ;;  %v4668_v31 = vadd.f32 %v4181_v50, %v3408_v28 }
 0x32c   :  { %v4669_v29 = vadd.f32 %v3408_v28, %v2492_v12 }
 0x32e   :  { %v4184_v43 = vpop.f32.mrb[4].mxu1  ;;  %2694 = vxpose.xlu0.b32.cont [2/16] (narrow) %v4666_v38, 8 }
 0x32f   :  { %v2504_v58 = vpop.f32.mrb[5].mxu1  ;;  %v4670_v63 = vadd.f32 %v4184_v43, %v3408_v28 }
 0x330   :  { %v4671_v4 = vadd.f32 %v3408_v28, %v2504_v58 }
 0x332   :  { %v4187_v3 = vpop.f32.mrb[6].mxu1  ;;  %2695 = vxpose.xlu0.b32.cont [3/16] (narrow) %v4669_v29, 8 }
 0x333   :  { %v2516_v52 = vpop.f32.mrb[7].mxu1  ;;  %v4672_v12 = vadd.f32 %v4187_v3, %v3408_v28 }
 0x334   :  { %v4673_v10 = vadd.f32 %v3408_v28, %v2516_v52 }
 0x336   :  { %v4190_v19 = vpop.f32.mrb[8].mxu1  ;;  %2696 = vxpose.xlu0.b32.cont [4/16] (narrow) %v4668_v31, 8 }
 0x337   :  { %v2528_v35 = vpop.f32.mrb[9].mxu1  ;;  %v4674_v50 = vadd.f32 %v4190_v19, %v3408_v28 }
 0x338   :  { %v4675_v38 = vadd.f32 %v3408_v28, %v2528_v35 }
 0x33a   :  { %v4193_v36 = vpop.f32.mrb[10].mxu1  ;;  %2697 = vxpose.xlu0.b32.cont [5/16] (narrow) %v4671_v4, 8 }
 0x33b   :  { %v2540_v2 = vpop.f32.mrb[11].mxu1  ;;  %v4676_v58 = vadd.f32 %v4193_v36, %v3408_v28 }
 0x33c   :  { %v4677_v29 = vadd.f32 %v3408_v28, %v2540_v2 }
 0x33e   :  { %v4196_v37 = vpop.f32.mrb[12].mxu1  ;;  %2698 = vxpose.xlu0.b32.cont [6/16] (narrow) %v4670_v63, 8 }
 0x33f   :  { %v2552_v45 = vpop.f32.mrb[13].mxu1  ;;  %v4678_v43 = vadd.f32 %v4196_v37, %v3408_v28 }
 0x340   :  { %v4679_v31 = vadd.f32 %v3408_v28, %v2552_v45 }
 0x342   :  { %v4199_v24 = vpop.f32.mrb[14].mxu1  ;;  %2699 = vxpose.xlu0.b32.cont [7/16] (narrow) %v4673_v10, 8 }
 0x343   :  { %v2564_v32 = vpop.f32.mrb[15].mxu1  ;;  %v4680_v52 = vadd.f32 %v4199_v24, %v3408_v28 }
 0x344   :  { %v4681_v4 = vadd.f32 %v3408_v28, %v2564_v32 }
 0x346   :  { %2700 = vxpose.xlu0.b32.cont [8/16] (narrow) %v4672_v12, 8 }
 0x34a   :  { %2701 = vxpose.xlu0.b32.cont [9/16] (narrow) %v4675_v38, 8 }
 0x34e   :  { %2702 = vxpose.xlu0.b32.cont [10/16] (narrow) %v4674_v50, 8 }
 0x352   :  { %2703 = vxpose.xlu0.b32.cont [11/16] (narrow) %v4677_v29, 8 }
 0x356   :  { %2704 = vxpose.xlu0.b32.cont [12/16] (narrow) %v4676_v58, 8 }
 0x35a   :  { %2705 = vxpose.xlu0.b32.cont [13/16] (narrow) %v4679_v31, 8 }
 0x35e   :  { %2706 = vxpose.xlu0.b32.cont [14/16] (narrow) %v4678_v43, 8 }
 0x362   :  { %2707 = vxpose.xlu0.b32.cont [15/16] (narrow) %v4681_v4, 8 }
 0x366   :  { %2708 = vxpose.xlu0.b32.end [16/16] (narrow) %v4680_v52, 8 }
 0x3aa   :  { %v2709_v63 = vpop.trf.xlu0 }
 0x3ab   :  { %v6003_v10 = vand.u32 4294901760, %v2709_v63 }
 0x3ad   :  { %v2807_v3 = vsub.f32 %v2709_v63, %v6003_v10  ;;  %4268 = vmatmul.mubr.f32.vlgmr.msra.gmra.mrb[16].mxu1 %v6003_v10 }
 0x3ae   :  { %4580 = vmatpush3.bf16.msk.msra.mxu1 %vm5797_vm4, %v4937_v8  ;;  %4337 = vmatprep.mubr.msk.f32.mxu1 %vm4938_vm13, %v4935_v9 }
 0x3af   :  { %v2808_v19 = vand.u32 4294901760, %v2807_v3  ;;  %4581 = vmatprep.subr.bf16.mxu1 %v4936_v30 }
 0x3b1   :  { %v2809_v35 = vsub.f32 %v2807_v3, %v2808_v19 }
 0x3b2   :  { %4583 = vmatpush3.bf16.msk.msra.mxu1 %vm5822_vm6, %v4937_v8 }
 0x3b3   :  { %v2810_v28 = vand.u32 4294901760, %v2809_v35  ;;  %4584 = vmatprep.subr.bf16.mxu1 %v4936_v30 }
 0x3b5   :  { %4233 = vmatmul.mubr.f32.vlgmr.msra.gmra.mrb[16].mxu0 %v2810_v28 }
 0x3b6   :  { %4556 = vmatpush3.bf16.msra.mxu0 %v4555_v51  ;;  %4586 = vmatpush3.bf16.msk.msra.mxu1 %vm5842_vm9, %v4937_v8 }
 0x3b7   :  { %4557 = vmatprep.subr.bf16.mxu0 %v4936_v30  ;;  %4587 = vmatprep.subr.bf16.mxu1 %v4936_v30 }
 0x3b8   :  { %4302 = vmatprep.mubr.msk.f32.mxu0 %vm4938_vm13, %v4935_v9 }
 0x3ba   :  { %4559 = vmatpush3.bf16.msra.mxu0 %v4558_v60  ;;  %4589 = vmatpush3.bf16.msk.msra.mxu1 %vm5867_vm12, %v4937_v8 }
 0x3bb   :  { %4560 = vmatprep.subr.bf16.mxu0 %v4936_v30  ;;  %4590 = vmatprep.subr.bf16.mxu1 %v4936_v30 }
 0x3be   :  { %4562 = vmatpush3.bf16.msra.mxu0 %v4561_v20  ;;  %4592 = vmatpush3.bf16.msk.msra.mxu1 %vm5889_vm15, %v4937_v8 }
 0x3bf   :  { %4563 = vmatprep.subr.bf16.mxu0 %v4936_v30  ;;  %4593 = vmatprep.subr.bf16.mxu1 %v4936_v30 }
 0x3c2   :  { %4565 = vmatpush3.bf16.msra.mxu0 %v4564_v48  ;;  %4595 = vmatpush3.bf16.msk.msra.mxu1 %vm5912_vm2, %v4937_v8 }
 0x3c3   :  { %4566 = vmatprep.subr.bf16.mxu0 %v4936_v30  ;;  %4596 = vmatprep.subr.bf16.mxu1 %v4936_v30 }
 0x3c6   :  { %4568 = vmatpush3.bf16.msra.mxu0 %v4567_v56  ;;  %4598 = vmatpush3.bf16.msk.msra.mxu1 %vm5937_vm7, %v4937_v8 }
 0x3c7   :  { %4569 = vmatprep.subr.bf16.mxu0 %v4936_v30  ;;  %4599 = vmatprep.subr.bf16.mxu1 %v4936_v30 }
 0x3ca   :  { %4571 = vmatpush3.bf16.msra.mxu0 %v4570_v33  ;;  %4601 = vmatpush3.bf16.msk.msra.mxu1 %vm5962_vm11, %v4937_v8 }
 0x3cb   :  { %4572 = vmatprep.subr.bf16.mxu0 %v4936_v30  ;;  %4626 = vmatprep.subr.bf16.mxu1 %v4936_v30 }
 0x3cd   :  { %4338 = vmatmul.mubr.f32.vlgmr.msra.gmra.mrb[18].mxu1 %v2808_v19 }
 0x3ce   :  { %4574 = vmatpush3.bf16.msra.mxu0 %v4573_v61  ;;  %4628 = vmatpush3.bf16.msk.msra.mxu1 %vm5797_vm4, %v4937_v8 }
 0x3cf   :  { %4575 = vmatprep.subr.bf16.mxu0 %v4936_v30  ;;  %4629 = vmatprep.subr.bf16.mxu1 %v4936_v30 }
 0x3d0   :  { %4407 = vmatprep.mubr.msk.f32.mxu1 %vm4938_vm13, %v4935_v9 }
 0x3d2   :  { %4577 = vmatpush3.bf16.msra.mxu0 %v4576_v18  ;;  %4631 = vmatpush3.bf16.msk.msra.mxu1 %vm5822_vm6, %v4937_v8 }
 0x3d3   :  { %4602 = vmatprep.subr.bf16.mxu0 %v4936_v30  ;;  %4632 = vmatprep.subr.bf16.mxu1 %v4936_v30 }
 0x3d5   :  { %4303 = vmatmul.mubr.f32.vlgmr.msra.gmra.mrb[18].mxu0 %v2807_v3 }
 0x3d6   :  { %4604 = vmatpush3.bf16.msra.mxu0 %v5851_v11  ;;  %4634 = vmatpush3.bf16.msk.msra.mxu1 %vm5842_vm9, %v4937_v8 }
 0x3d7   :  { %4605 = vmatprep.subr.bf16.mxu0 %v4936_v30  ;;  %4635 = vmatprep.subr.bf16.mxu1 %v4936_v30 }
 0x3d8   :  { %4372 = vmatprep.mubr.msk.f32.mxu0 %vm4938_vm13, %v4935_v9 }
 0x3da   :  { %4607 = vmatpush3.bf16.msra.mxu0 %v5997_v59  ;;  %4637 = vmatpush3.bf16.msk.msra.mxu1 %vm5867_vm12, %v4937_v8 }
 0x3db   :  { %4608 = vmatprep.subr.bf16.mxu0 %v4936_v30  ;;  %4638 = vmatprep.subr.bf16.mxu1 %v4936_v30 }
 0x3de   :  { %4610 = vmatpush3.bf16.msra.mxu0 %v5901_v25  ;;  %4640 = vmatpush3.bf16.msk.msra.mxu1 %vm5889_vm15, %v4937_v8 }
 0x3df   :  { %4611 = vmatprep.subr.bf16.mxu0 %v4936_v30  ;;  %4641 = vmatprep.subr.bf16.mxu1 %v4936_v30 }
 0x3e2   :  { %4613 = vmatpush3.bf16.msra.mxu0 %v5926_v49  ;;  %4643 = vmatpush3.bf16.msk.msra.mxu1 %vm5912_vm2, %v4937_v8 }
 0x3e3   :  { %4614 = vmatprep.subr.bf16.mxu0 %v4936_v30  ;;  %4644 = vmatprep.subr.bf16.mxu1 %v4936_v30 }
 0x3e6   :  { %4616 = vmatpush3.bf16.msra.mxu0 %v5951_v62  ;;  %4646 = vmatpush3.bf16.msk.msra.mxu1 %vm5937_vm7, %v4937_v8 }
 0x3e7   :  { %4617 = vmatprep.subr.bf16.mxu0 %v4936_v30  ;;  %4647 = vmatprep.subr.bf16.mxu1 %v4936_v30 }
 0x3ea   :  { %4619 = vmatpush3.bf16.msra.mxu0 %v5974_v23  ;;  %4649 = vmatpush3.bf16.msk.msra.mxu1 %vm5962_vm11, %v4937_v8 }
 0x3eb   :  { %4620 = vmatprep.subr.bf16.mxu0 %v4936_v30 }
 0x3ed   :  { %4408 = vmatmul.mubr.f32.vlgmr.msra.gmra.mrb[20].mxu1 %v6003_v10 }
 0x3ee   :  { %4622 = vmatpush3.bf16.msra.mxu0 %v5987_v15 }
 0x3ef   :  { %4623 = vmatprep.subr.bf16.mxu0 %v4936_v30 }
 0x3f2   :  { %4625 = vmatpush3.bf16.msra.mxu0 %v5990_v47 }
 0x3f5   :  { %4373 = vmatmul.mubr.f32.vlgmr.msra.gmra.mrb[20].mxu0 %v6003_v10 }
 0x480   :  { %v2963_v9 = vpop.f32.mrb[16].mxu1 }
 0x481   :  { %v4269_v5 = vpop.f32.mrb[17].mxu1 }
 0x488   :  { %v2812_v1 = vpop.f32.mrb[16].mxu0 }
 0x489   :  { %v2964_v46 = vadd.f32 %v2963_v9, %v2812_v1  ;;  %v4234_v57 = vpop.f32.mrb[17].mxu0 }
 0x4a0   :  { %v3156_v51 = vpop.f32.mrb[18].mxu1 }
 0x4a1   :  { %v4339_v14 = vpop.f32.mrb[19].mxu1 }
 0x4a8   :  { %v3067_v8 = vpop.f32.mrb[18].mxu0 }
 0x4a9   :  { %v3068_v22 = vadd.f32 %v3067_v8, %v2964_v46  ;;  %v4304_v60 = vpop.f32.mrb[19].mxu0 }
 0x4ab   :  { %v3157_v54 = vadd.f32 %v3156_v51, %v3068_v22 }
 0x4c0   :  { %v3362_v42 = vpop.f32.mrb[20].mxu1 }
 0x4c1   :  { %v4409_v53 = vpop.f32.mrb[21].mxu1 }
 0x4c8   :  { %v3275_v11 = vpop.f32.mrb[20].mxu0 }
 0x4c9   :  { %v3276_v20 = vadd.f32 %v3275_v11, %v3157_v54  ;;  %v4374_v30 = vpop.f32.mrb[21].mxu0 }
 0x4cb   :  { %v3363_v27 = vadd.f32 %v3362_v42, %v3276_v20 }
 0x4cd   :  { %v3366_v17 = vadd.f32 %v3363_v27, %v2692_v7 }
 0x4cf   :  { %3367 = vst [vmem:[#allocation3] sm:$0x1] %v3366_v17 }
 0x4d0   :  { %4922 = shalt.err (!%p4919_p4)
}
 0x4d1   :  { %s4923_s25 = scalar_lea.hbm %s6145_s6, 16 }
 0x4d2   :  { %p4924_p5 = scmp.ne.s32.totalorder %s6145_s6, %s4923_s25  ;;  %p4927_p6 = scmp.lt.u32.totalorder %s4923_s25, %s6145_s6 }
 0x4d4   :  { %p4929_p7 = pnand %p4927_p6, %p4924_p5 }
 0x4d6   :  { %4932 = shalt.err (!%p4929_p7)
}
 0x4d7   :  { %3377 = dma.vmem_to_hbm [thread:$0]  %s3375_s20, 16, %s6145_s6, [#allocation4]  }
 0x4d8   :  { %4933 = dma.done.wait [#allocation4], 16  }
 0x4d9   :  { %4934 = vsyncadd [#allocation4], 4294967280 }
 0x4da   :  { %3381 = vsyncpa [#allocation4], 1 }

</bundles_post_ra>
